<compile_context>
chip_gen: v6e
topology: v6e:2x2x1
jax: 0.10.0
libtpu: 0.0.40
codegen_flags: <defaults>
</compile_context>

<pallas_src>
import functools
import numpy as np
import jax
import jax.numpy as jnp
from jax.experimental import pallas as pl
from jax.experimental.pallas import tpu as pltpu

# ---------------- configuration (the `args` of denoise_net) ----------------
B = 2              # batch
SEQ_LEN = 8        # args.sequence_length
PRED_LEN = 8       # args.prediction_length
TARGET_DIM = 16    # args.target_dim == args.input_dim
EMB_DIM = 32       # args.embedding_dimension
HIDDEN = 32        # args.hidden_size (GRU)
FREQ_DIM = 4       # time-feature ("mark") width
LATENT = 8         # latent dim of the (simplified) BVAE encoder
DIFF_STEPS = 100   # args.diff_steps
BETA_START = 0.0   # args.beta_start
BETA_END = 0.01    # args.beta_end
SCALE = 0.1        # args.scale
SCORE_H1 = 64      # Res12_Quadratic width 64
SCORE_H2 = 32      # Res12_Quadratic width 32
M_FLAT = PRED_LEN * TARGET_DIM          # 128  (lane-dense)
X_FLAT = SEQ_LEN * (EMB_DIM + HIDDEN)   # 512
XCAT_W = 3 * TARGET_DIM + FREQ_DIM      # 52   (im2col + mark)

# ---- packed-noise lane offsets (all block starts are multiples of 128 where it matters) ----
NOISE_NX = 0                               # (B, X_FLAT)  encoder-input noise
NOISE_NY = X_FLAT                          # (B, M_FLAT)  target noise
NOISE_ES = X_FLAT + M_FLAT                 # (B, M_FLAT)  output.sample() eps
NOISE_EZ = X_FLAT + 2 * M_FLAT             # (B, LATENT)  reparameterization eps
NOISE_W = X_FLAT + 2 * M_FLAT + LATENT     # 776

# ---- pslab_emb (width 96 = 3H) row offsets: embedding + GRU ----
P96_EMBW = 0      # (3C+F, E) fused circular-conv-im2col + temporal embedding weight
P96_POS = 56      # (L*B, E) positional table (time-major, batch-repeated)
P96_WIH = 72      # (E, 3H)  GRU input weights  [r|z|n]
P96_WHH = 104     # (H, 3H)  GRU recurrent weights [r|z|n] (packed-gate matmul)
P96_GIB = 136     # (1, 3H)  b_ih + [b_hr, b_hz, 0]  (hoisted into gi)
P96_BHN = 137     # (1, H)   b_hn
P96_ROWS = 144

# ---- pslab_enc (width 2Z) row offsets ----
PENC_BENC = X_FLAT          # (1, 2Z) encoder bias row
PENC_ROWS = X_FLAT + 8      # 520

# ---- pslab_dec (width 2M = 256) row offsets: decoder + score net ----
P256_WDEC = 0      # (Z, 2M)
P256_BDEC = 8      # (1, 2M)
P256_W1 = 16       # (M, 64)
P256_W1T = 144     # (64, M)   precomputed transpose
P256_W2 = 208      # (64, 32)
P256_W2T = 272     # (32, 64)  precomputed transpose
P256_B1 = 304      # (1, 64)
P256_B2 = 305      # (1, 32)
P256_ROWS = 312

_VMEM = functools.partial(pl.BlockSpec, memory_space=pltpu.MemorySpace.VMEM)
_SMEM = functools.partial(pl.BlockSpec, memory_space=pltpu.MemorySpace.SMEM)


# ============================= fused Pallas kernel =============================

def fused_denoise_kernel(
    # SMEM: diffusion step indices + packed schedule table (rows: sqrt_acp, sqrt_1m_acp, sigmas)
    t_ref, sched_ref,
    # data (VMEM): im2col+mark slab (time-major rows), flat target, packed noise
    xcat_ref, y_ref, noise_ref,
    # parameter slabs (VMEM)
    pemb_ref, penc_ref, pdec_ref,
    # output: lane-dense slab [mu | log_sigma | y_noisy | z,tc,loss,0-pad]
    out_ref,
    *, scale):
    f32 = jnp.float32
    B_, L, C, F = B, SEQ_LEN, TARGET_DIM, FREQ_DIM
    E, H, Z, M = EMB_DIM, HIDDEN, LATENT, M_FLAT
    D = H + E

    # ---- per-sample diffusion coefficients: scalar SMEM reads + (B-1) selects per table ----
    row = jax.lax.broadcasted_iota(jnp.int32, (B_, 1), 0)

    def coef(k):
        c = jnp.zeros((B_, 1), f32) + sched_ref[k, t_ref[0]]
        for i in range(1, B_):
            c = jnp.where(row == i, sched_ref[k, t_ref[i]], c)
        return c

    a_col = coef(0)       # sqrt(alphas_cumprod)[t]       (B, 1)
    b_col = coef(1)       # sqrt(1 - alphas_cumprod)[t]   (B, 1)
    sig_col = coef(2)     # (1 - alphas_cumprod)[t]       (B, 1)

    # ---- DataEmbedding: ONE fused matmul (circular conv im2col + temporal) + positional ----
    w_emb = pemb_ref[P96_EMBW:P96_EMBW + 3 * C + F, 0:E]            # (52, E)
    pos = pemb_ref[P96_POS:P96_POS + L * B_, 0:E]                   # (L*B, E)
    emb = jnp.dot(xcat_ref[...], w_emb, preferred_element_type=f32) + pos   # (L*B, E)

    # ---- single-layer batch_first GRU (PyTorch gate semantics) ----
    # Input projection hoisted out of the recurrence; b_ih + b_hr/b_hz folded into gi;
    # per-step recurrence is ONE packed (B,H)@(H,3H) matmul, gates split by lane slices.
    w_ih = pemb_ref[P96_WIH:P96_WIH + E, :]                         # (E, 3H)
    w_hh = pemb_ref[P96_WHH:P96_WHH + H, :]                         # (H, 3H)
    gi = jnp.dot(emb, w_ih, preferred_element_type=f32) + pemb_ref[P96_GIB:P96_GIB + 1, :]
    bhn = jnp.broadcast_to(pemb_ref[P96_BHN:P96_BHN + 1, 0:H], (B_, H))   # hoisted broadcast

    h = jnp.zeros((B_, H), f32)
    enc_acc = jnp.zeros((B_, 2 * Z), f32)
    for step in range(L):              # fully unrolled (L static & small)
        r0 = step * B_
        gh = jnp.dot(h, w_hh, preferred_element_type=f32)            # (B, 3H) one MXU dispatch
        r = jax.nn.sigmoid(gi[r0:r0 + B_, 0:H] + gh[:, 0:H])
        u = jax.nn.sigmoid(gi[r0:r0 + B_, H:2 * H] + gh[:, H:2 * H])
        n = jnp.tanh(gi[r0:r0 + B_, 2 * H:3 * H] + r * (gh[:, 2 * H:3 * H] + bhn))
        h = (1.0 - u) * n + u * h
        # encoder contribution of this step: input = cat([time_feat, emb], -1);
        # the (B,1) q_sample scale commutes through the matmul, so x_flat is never
        # materialized and there is no scratch round trip.
        he = jnp.concatenate([h, emb[r0:r0 + B_, :]], axis=-1)        # (B, H+E)
        enc_acc = enc_acc + jnp.dot(he, penc_ref[step * D:(step + 1) * D, 0:2 * Z],
                                    preferred_element_type=f32)

    # ---- packed noise slices ----
    nx = noise_ref[:, NOISE_NX:NOISE_NX + X_FLAT]     # (B, 512)
    ny = noise_ref[:, NOISE_NY:NOISE_NY + M]          # (B, 128)
    epss = noise_ref[:, NOISE_ES:NOISE_ES + M]        # (B, 128)
    epsz = noise_ref[:, NOISE_EZ:NOISE_EZ + Z]        # (B, 8)

    # ---- coupled diffusion q_sample + simplified BVAE encode / reparameterize / decode ----
    # TODO(synk): D3VAE's coupled diffusion uses slightly different (scaled) schedules for
    # input vs. target; both use the denoise_net schedule here (as in revision 1).
    henc = (scale * a_col) * enc_acc \
        + b_col * jnp.dot(nx, penc_ref[0:X_FLAT, 0:2 * Z], preferred_element_type=f32) \
        + penc_ref[PENC_BENC:PENC_BENC + 1, 0:2 * Z]                 # (B, 2Z)
    z_mu = henc[:, 0:Z]
    z_logvar = henc[:, Z:2 * Z]
    z = z_mu + jnp.exp(0.5 * z_logvar) * epsz

    y_flat = y_ref[...]
    y_noisy = a_col * (scale * y_flat) + b_col * ny                  # (B, M)

    dec = jnp.dot(z, pdec_ref[P256_WDEC:P256_WDEC + Z, :], preferred_element_type=f32) \
        + pdec_ref[P256_BDEC:P256_BDEC + 1, :]                       # (B, 2M)
    mu = dec[:, 0:M]
    log_sigma = dec[:, M:2 * M]

    # ---- total correlation (minibatch-weighted estimator), 2-D elementwise + lane reductions ----
    log2pi = jnp.float32(np.log(2.0 * np.pi))
    log_B = jnp.float32(np.log(float(B_)))
    lq = []
    for j in range(B_):                # B tiny & static
        mu_j = z_mu[j:j + 1, :]
        lv_j = z_logvar[j:j + 1, :]
        lq.append(-0.5 * ((z - mu_j) ** 2 * jnp.exp(-lv_j) + lv_j + log2pi))   # (B, Z)
    s_list = [jnp.sum(q, axis=-1, keepdims=True) for q in lq]                  # (B, 1) each
    m_s = s_list[0]
    for sj in s_list[1:]:
        m_s = jnp.maximum(m_s, sj)
    log_qz = m_s + jnp.log(sum(jnp.exp(sj - m_s) for sj in s_list)) - log_B    # (B, 1)
    m_d = lq[0]
    for qj in lq[1:]:
        m_d = jnp.maximum(m_d, qj)
    lse_d = m_d + jnp.log(sum(jnp.exp(qj - m_d) for qj in lq)) - log_B         # (B, Z)
    tc = log_qz - jnp.sum(lse_d, axis=-1, keepdims=True)                       # (B, 1)

    # ---- output.sample(), score-net energy, manual backward, score-matching loss ----
    x_samp = mu + jnp.exp(log_sigma) * epss                                    # y_noisy1 (B, M)
    w1 = pdec_ref[P256_W1:P256_W1 + M, 0:SCORE_H1]
    w2 = pdec_ref[P256_W2:P256_W2 + SCORE_H1, 0:SCORE_H2]
    a1 = jnp.dot(x_samp, w1, preferred_element_type=f32) + pdec_ref[P256_B1:P256_B1 + 1, 0:SCORE_H1]
    h1 = jnp.where(a1 > 0, a1, jnp.exp(a1) - 1.0)                              # ELU
    a2 = jnp.dot(h1, w2, preferred_element_type=f32) + pdec_ref[P256_B2:P256_B2 + 1, 0:SCORE_H2]
    h2 = jnp.where(a2 > 0, a2, jnp.exp(a2) - 1.0)                              # ELU
    # E = 0.5 * sum(h2^2)  ->  manual backward (replaces torch.autograd.grad):
    g2 = h2 * jnp.where(a2 > 0, 1.0, jnp.exp(a2))                              # dE/da2
    g1 = jnp.dot(g2, pdec_ref[P256_W2T:P256_W2T + SCORE_H2, 0:SCORE_H1],
                 preferred_element_type=f32) * jnp.where(a1 > 0, 1.0, jnp.exp(a1))
    grad_x = jnp.dot(g1, pdec_ref[P256_W1T:P256_W1T + SCORE_H1, 0:M],
                     preferred_element_type=f32)                               # dE/dx
    diff = y_flat - x_samp + 0.001 * grad_x
    loss_ps = jnp.sum(diff * diff, axis=-1, keepdims=True) * sig_col           # (B, 1)

    # ---- single full-width lane-aligned store ----
    tail = jnp.concatenate([z, tc, loss_ps, jnp.zeros((B_, M - Z - 2), f32)], axis=-1)  # (B, 128)
    out_ref[...] = jnp.concatenate([mu, log_sigma, y_noisy, tail], axis=-1)             # (B, 512)


# ============================= parameters (packed slabs) =============================

def init_params(key):
    ks = jax.random.split(key, 10)

    def nrm(k, shape, s=0.1):
        return np.array(s * jax.random.normal(k, shape, dtype=jnp.float32))

    # fixed positional-encoding table, pre-tiled to time-major (t, b) row order
    pos = np.arange(SEQ_LEN, dtype=np.float32)[:, None]
    div = np.exp(np.arange(0, EMB_DIM, 2, dtype=np.float32) * -(np.log(10000.0) / EMB_DIM))
    pe = np.zeros((SEQ_LEN, EMB_DIM), np.float32)
    pe[:, 0::2] = np.sin(pos * div)
    pe[:, 1::2] = np.cos(pos * div)
    pe_tm = np.repeat(pe, B, axis=0)                               # (L*B, E)

    # get_beta_schedule('linear', ...); alphas = 1 - sigmas*0.5 exactly as in the reference
    betas = np.linspace(BETA_START, BETA_END, DIFF_STEPS, dtype=np.float64)
    alphas = 1.0 - betas * 0.5
    acp = np.cumprod(alphas, axis=0)
    sched = np.stack([np.sqrt(acp), np.sqrt(1.0 - acp), 1.0 - acp]).astype(np.float32)  # (3, T)

    # raw parameters
    w_tok = nrm(ks[0], (3 * TARGET_DIM, EMB_DIM))        # circular Conv1d(k=3), im2col row layout
    w_temp = nrm(ks[1], (FREQ_DIM, EMB_DIM))             # TimeFeatureEmbedding (bias-free linear)
    gru_w_ih = nrm(ks[2], (EMB_DIM, 3 * HIDDEN))
    gru_w_hh = nrm(ks[3], (HIDDEN, 3 * HIDDEN))          # packed [r|z|n] columns
    gru_b_ih = nrm(ks[4], (1, 3 * HIDDEN))
    gru_b_hh = nrm(ks[5], (1, 3 * HIDDEN))
    w_enc = nrm(ks[6], (X_FLAT, 2 * LATENT))             # rows in per-step [h_t | emb_t] order
    w_dec = nrm(ks[7], (LATENT, 2 * M_FLAT))
    score_w1 = nrm(ks[8], (M_FLAT, SCORE_H1))
    score_w2 = nrm(ks[9], (SCORE_H1, SCORE_H2))

    # gi bias: b_ih (all gates) + b_hr/b_hz folded (b_hn stays inside r*(.) per PyTorch GRU)
    gi_bias = gru_b_ih.copy()
    gi_bias[:, 0:2 * HIDDEN] += gru_b_hh[:, 0:2 * HIDDEN]

    # ---- slab 1: embedding + GRU (width 96) ----
    slab_emb = np.zeros((P96_ROWS, 3 * HIDDEN), np.float32)
    slab_emb[P96_EMBW:P96_EMBW + 3 * TARGET_DIM, 0:EMB_DIM] = w_tok
    slab_emb[P96_EMBW + 3 * TARGET_DIM:P96_EMBW + XCAT_W, 0:EMB_DIM] = w_temp
    slab_emb[P96_POS:P96_POS + SEQ_LEN * B, 0:EMB_DIM] = pe_tm
    slab_emb[P96_WIH:P96_WIH + EMB_DIM, :] = gru_w_ih
    slab_emb[P96_WHH:P96_WHH + HIDDEN, :] = gru_w_hh
    slab_emb[P96_GIB, :] = gi_bias[0]
    slab_emb[P96_BHN, 0:HIDDEN] = gru_b_hh[0, 2 * HIDDEN:3 * HIDDEN]

    # ---- slab 2: BVAE encoder (width 2Z) ----
    slab_enc = np.zeros((PENC_ROWS, 2 * LATENT), np.float32)
    slab_enc[0:X_FLAT, :] = w_enc
    # slab_enc[PENC_BENC] stays 0 (b_enc = 0, as before)

    # ---- slab 3: decoder + score net (width 256), transposes precomputed once ----
    slab_dec = np.zeros((P256_ROWS, 2 * M_FLAT), np.float32)
    slab_dec[P256_WDEC:P256_WDEC + LATENT, :] = w_dec
    # slab_dec[P256_BDEC] stays 0 (b_dec = 0, as before)
    slab_dec[P256_W1:P256_W1 + M_FLAT, 0:SCORE_H1] = score_w1
    slab_dec[P256_W1T:P256_W1T + SCORE_H1, 0:M_FLAT] = score_w1.T
    slab_dec[P256_W2:P256_W2 + SCORE_H1, 0:SCORE_H2] = score_w2
    slab_dec[P256_W2T:P256_W2T + SCORE_H2, 0:SCORE_H1] = score_w2.T
    # slab_dec[P256_B1], slab_dec[P256_B2] stay 0 (score biases = 0, as before)

    return {
        'sched': jnp.asarray(sched),
        'pslab_emb': jnp.asarray(slab_emb),
        'pslab_enc': jnp.asarray(slab_enc),
        'pslab_dec': jnp.asarray(slab_dec),
    }


# ============================= denoise_net.forward =============================

def denoise_net_forward(params, past_time_feat, mark, future_time_feat, t, noise_key):
    # Layout plumbing only (no compute): time-major (t, b) rows + circular-conv im2col
    # + mark concat assembled in the wrapper so the kernel needs no scratch assembly
    # and gets a single lane-dense data slab.
    x_tm = jnp.transpose(past_time_feat, (1, 0, 2)).reshape(SEQ_LEN * B, TARGET_DIM)
    mark_tm = jnp.transpose(mark, (1, 0, 2)).reshape(SEQ_LEN * B, FREQ_DIM)
    x_prev = jnp.roll(x_tm, B, axis=0)     # x[t-1] (circular wrap, per-batch)
    x_next = jnp.roll(x_tm, -B, axis=0)    # x[t+1] (circular wrap, per-batch)
    xcat = jnp.concatenate([x_prev, x_tm, x_next, mark_tm], axis=-1)   # (L*B, 3C+F)
    y_flat = future_time_feat.reshape(B, M_FLAT).astype(jnp.float32)
    noise = jax.random.normal(noise_key, (B, NOISE_W), jnp.float32)    # one packed noise DMA

    out = pl.pallas_call(
        functools.partial(fused_denoise_kernel, scale=SCALE),
        out_shape=jax.ShapeDtypeStruct((B, 4 * M_FLAT), jnp.float32),
        in_specs=[_SMEM(), _SMEM()] + [_VMEM()] * 6,
        out_specs=_VMEM(),
    )(
        t.astype(jnp.int32), params['sched'],
        xcat, y_flat, noise,
        params['pslab_emb'], params['pslab_enc'], params['pslab_dec'],
    )

    mu = out[:, 0:M_FLAT]
    log_sigma = out[:, M_FLAT:2 * M_FLAT]
    y_noisy = out[:, 2 * M_FLAT:3 * M_FLAT]
    z = out[:, 3 * M_FLAT:3 * M_FLAT + LATENT]
    total_c = jnp.mean(out[:, 3 * M_FLAT + LATENT])
    loss = jnp.mean(out[:, 3 * M_FLAT + LATENT + 1])

    output = (mu.reshape(B, 1, PRED_LEN, TARGET_DIM),
              jnp.exp(log_sigma).reshape(B, 1, PRED_LEN, TARGET_DIM))  # Normal(mu, sigma)
    all_z = [z]
    return output, y_noisy.reshape(B, PRED_LEN, TARGET_DIM), total_c, all_z, loss


# ============================= main =============================

if __name__ == "__main__":
    root = jax.random.PRNGKey(0)
    k_param, k_data, k_noise = jax.random.split(root, 3)
    params = init_params(k_param)

    kd = jax.random.split(k_data, 3)
    past_time_feat = jax.random.normal(kd[0], (B, SEQ_LEN, TARGET_DIM), jnp.float32)
    mark = jax.random.normal(kd[1], (B, SEQ_LEN, FREQ_DIM), jnp.float32)
    future_time_feat = jax.random.normal(kd[2], (B, PRED_LEN, TARGET_DIM), jnp.float32)
    t = jnp.array([5, 50], dtype=jnp.int32)

    fwd = jax.jit(functools.partial(denoise_net_forward, params))
    output, y_noisy, total_c, all_z, loss = fwd(past_time_feat, mark, future_time_feat, t, k_noise)
    jax.block_until_ready((output, y_noisy, total_c, all_z, loss))
    print("KERNEL_OK")
</pallas_src>

<mosaic_0001>
module attributes {stable_mosaic.version = 11 : i64} {
  func.func @fused_denoise_kernel(%arg0: memref<2xi32, #tpu.memory_space<smem>>, %arg1: memref<3x100xf32, #tpu.memory_space<smem>>, %arg2: memref<16x52xf32, #tpu.memory_space<vmem>>, %arg3: memref<2x128xf32, #tpu.memory_space<vmem>>, %arg4: memref<2x776xf32, #tpu.memory_space<vmem>>, %arg5: memref<144x96xf32, #tpu.memory_space<vmem>>, %arg6: memref<520x16xf32, #tpu.memory_space<vmem>>, %arg7: memref<312x256xf32, #tpu.memory_space<vmem>>, %arg8: memref<2x512xf32, #tpu.memory_space<vmem>>) attributes {dimension_semantics = [], scalar_prefetch = 0 : i64, scratch_operands = 0 : i64, tpu.core_type = #tpu.core_type<tc>} {
    %0 = tpu.iota {dimensions = array<i32: 0>} : vector<2x1xi32>
    %cst = arith.constant 0.000000e+00 : f32
    %1 = vector.broadcast %cst : f32 to vector<2x1xf32>
    %c0 = arith.constant 0 : index
    %2 = memref.load %arg0[%c0] : memref<2xi32, #tpu.memory_space<smem>>
    %c0_0 = arith.constant 0 : index
    %3 = arith.index_cast %2 : i32 to index
    %4 = memref.load %arg1[%c0_0, %3] : memref<3x100xf32, #tpu.memory_space<smem>>
    %5 = vector.broadcast %4 : f32 to vector<2x1xf32>
    %6 = arith.addf %1, %5 : vector<2x1xf32>
    %c1_i32 = arith.constant 1 : i32
    %7 = vector.broadcast %c1_i32 : i32 to vector<2x1xi32>
    %8 = arith.cmpi eq, %0, %7 : vector<2x1xi32>
    %c1 = arith.constant 1 : index
    %9 = memref.load %arg0[%c1] : memref<2xi32, #tpu.memory_space<smem>>
    %c0_1 = arith.constant 0 : index
    %10 = arith.index_cast %9 : i32 to index
    %11 = memref.load %arg1[%c0_1, %10] : memref<3x100xf32, #tpu.memory_space<smem>>
    %12 = vector.broadcast %11 : f32 to vector<2x1xf32>
    %13 = arith.select %8, %12, %6 : vector<2x1xi1>, vector<2x1xf32>
    %cst_2 = arith.constant 0.000000e+00 : f32
    %14 = vector.broadcast %cst_2 : f32 to vector<2x1xf32>
    %c0_3 = arith.constant 0 : index
    %15 = memref.load %arg0[%c0_3] : memref<2xi32, #tpu.memory_space<smem>>
    %c1_4 = arith.constant 1 : index
    %16 = arith.index_cast %15 : i32 to index
    %17 = memref.load %arg1[%c1_4, %16] : memref<3x100xf32, #tpu.memory_space<smem>>
    %18 = vector.broadcast %17 : f32 to vector<2x1xf32>
    %19 = arith.addf %14, %18 : vector<2x1xf32>
    %c1_i32_5 = arith.constant 1 : i32
    %20 = vector.broadcast %c1_i32_5 : i32 to vector<2x1xi32>
    %21 = arith.cmpi eq, %0, %20 : vector<2x1xi32>
    %c1_6 = arith.constant 1 : index
    %22 = memref.load %arg0[%c1_6] : memref<2xi32, #tpu.memory_space<smem>>
    %c1_7 = arith.constant 1 : index
    %23 = arith.index_cast %22 : i32 to index
    %24 = memref.load %arg1[%c1_7, %23] : memref<3x100xf32, #tpu.memory_space<smem>>
    %25 = vector.broadcast %24 : f32 to vector<2x1xf32>
    %26 = arith.select %21, %25, %19 : vector<2x1xi1>, vector<2x1xf32>
    %cst_8 = arith.constant 0.000000e+00 : f32
    %27 = vector.broadcast %cst_8 : f32 to vector<2x1xf32>
    %c0_9 = arith.constant 0 : index
    %28 = memref.load %arg0[%c0_9] : memref<2xi32, #tpu.memory_space<smem>>
    %c2 = arith.constant 2 : index
    %29 = arith.index_cast %28 : i32 to index
    %30 = memref.load %arg1[%c2, %29] : memref<3x100xf32, #tpu.memory_space<smem>>
    %31 = vector.broadcast %30 : f32 to vector<2x1xf32>
    %32 = arith.addf %27, %31 : vector<2x1xf32>
    %c1_i32_10 = arith.constant 1 : i32
    %33 = vector.broadcast %c1_i32_10 : i32 to vector<2x1xi32>
    %34 = arith.cmpi eq, %0, %33 : vector<2x1xi32>
    %c1_11 = arith.constant 1 : index
    %35 = memref.load %arg0[%c1_11] : memref<2xi32, #tpu.memory_space<smem>>
    %c2_12 = arith.constant 2 : index
    %36 = arith.index_cast %35 : i32 to index
    %37 = memref.load %arg1[%c2_12, %36] : memref<3x100xf32, #tpu.memory_space<smem>>
    %38 = vector.broadcast %37 : f32 to vector<2x1xf32>
    %39 = arith.select %34, %38, %32 : vector<2x1xi1>, vector<2x1xf32>
    %c0_13 = arith.constant 0 : index
    %c0_14 = arith.constant 0 : index
    %40 = vector.load %arg5[%c0_13, %c0_14] : memref<144x96xf32, #tpu.memory_space<vmem>>, vector<52x32xf32>
    %c56 = arith.constant 56 : index
    %c0_15 = arith.constant 0 : index
    %41 = vector.load %arg5[%c56, %c0_15] : memref<144x96xf32, #tpu.memory_space<vmem>>, vector<16x32xf32>
    %c0_16 = arith.constant 0 : index
    %c0_17 = arith.constant 0 : index
    %42 = vector.load %arg2[%c0_16, %c0_17] : memref<16x52xf32, #tpu.memory_space<vmem>>, vector<16x52xf32>
    %cst_18 = arith.constant dense<0.000000e+00> : vector<16x32xf32>
    %43 = tpu.matmul %42, %40, %cst_18 {dimension_numbers = #tpu.dot_dimension_numbers<[1], [0], [0], [1], [0, 0, 1, 1], [], []>} : vector<16x52xf32>, vector<52x32xf32>, vector<16x32xf32> -> vector<16x32xf32>
    %44 = arith.addf %43, %41 : vector<16x32xf32>
    %c72 = arith.constant 72 : index
    %c0_19 = arith.constant 0 : index
    %45 = vector.load %arg5[%c72, %c0_19] : memref<144x96xf32, #tpu.memory_space<vmem>>, vector<32x96xf32>
    %c104 = arith.constant 104 : index
    %c0_20 = arith.constant 0 : index
    %46 = vector.load %arg5[%c104, %c0_20] : memref<144x96xf32, #tpu.memory_space<vmem>>, vector<32x96xf32>
    %cst_21 = arith.constant dense<0.000000e+00> : vector<16x96xf32>
    %47 = tpu.matmul %44, %45, %cst_21 {dimension_numbers = #tpu.dot_dimension_numbers<[1], [0], [0], [1], [0, 0, 1, 1], [], []>} : vector<16x32xf32>, vector<32x96xf32>, vector<16x96xf32> -> vector<16x96xf32>
    %c136 = arith.constant 136 : index
    %c0_22 = arith.constant 0 : index
    %48 = vector.load %arg5[%c136, %c0_22] : memref<144x96xf32, #tpu.memory_space<vmem>>, vector<1x96xf32>
    %49 = vector.broadcast %48 : vector<1x96xf32> to vector<16x96xf32>
    %50 = arith.addf %47, %49 : vector<16x96xf32>
    %c137 = arith.constant 137 : index
    %c0_23 = arith.constant 0 : index
    %51 = vector.load %arg5[%c137, %c0_23] : memref<144x96xf32, #tpu.memory_space<vmem>>, vector<1x32xf32>
    %52 = vector.shape_cast %51 : vector<1x32xf32> to vector<1x32xf32>
    %53 = vector.broadcast %52 : vector<1x32xf32> to vector<2x32xf32>
    %cst_24 = arith.constant 0.000000e+00 : f32
    %54 = vector.broadcast %cst_24 : f32 to vector<2x32xf32>
    %cst_25 = arith.constant 0.000000e+00 : f32
    %55 = vector.broadcast %cst_25 : f32 to vector<2x16xf32>
    %cst_26 = arith.constant dense<0.000000e+00> : vector<2x96xf32>
    %56 = tpu.matmul %54, %46, %cst_26 {dimension_numbers = #tpu.dot_dimension_numbers<[1], [0], [0], [1], [0, 0, 1, 1], [], []>} : vector<2x32xf32>, vector<32x96xf32>, vector<2x96xf32> -> vector<2x96xf32>
    %57 = vector.extract_strided_slice %50 {offsets = [0, 0], sizes = [2, 32], strides = [1, 1]} : vector<16x96xf32> to vector<2x32xf32>
    %58 = vector.extract_strided_slice %56 {offsets = [0, 0], sizes = [2, 32], strides = [1, 1]} : vector<2x96xf32> to vector<2x32xf32>
    %59 = arith.addf %57, %58 : vector<2x32xf32>
    %60 = arith.negf %59 : vector<2x32xf32>
    %61 = math.exp %60 : vector<2x32xf32>
    %cst_27 = arith.constant 1.000000e+00 : f32
    %62 = vector.broadcast %cst_27 : f32 to vector<2x32xf32>
    %63 = arith.addf %62, %61 : vector<2x32xf32>
    %64 = arith.divf %62, %63 : vector<2x32xf32>
    %65 = vector.extract_strided_slice %50 {offsets = [0, 32], sizes = [2, 32], strides = [1, 1]} : vector<16x96xf32> to vector<2x32xf32>
    %66 = vector.extract_strided_slice %56 {offsets = [0, 32], sizes = [2, 32], strides = [1, 1]} : vector<2x96xf32> to vector<2x32xf32>
    %67 = arith.addf %65, %66 : vector<2x32xf32>
    %68 = arith.negf %67 : vector<2x32xf32>
    %69 = math.exp %68 : vector<2x32xf32>
    %cst_28 = arith.constant 1.000000e+00 : f32
    %70 = vector.broadcast %cst_28 : f32 to vector<2x32xf32>
    %71 = arith.addf %70, %69 : vector<2x32xf32>
    %72 = arith.divf %70, %71 : vector<2x32xf32>
    %73 = vector.extract_strided_slice %50 {offsets = [0, 64], sizes = [2, 32], strides = [1, 1]} : vector<16x96xf32> to vector<2x32xf32>
    %74 = vector.extract_strided_slice %56 {offsets = [0, 64], sizes = [2, 32], strides = [1, 1]} : vector<2x96xf32> to vector<2x32xf32>
    %75 = arith.addf %74, %53 : vector<2x32xf32>
    %76 = arith.mulf %64, %75 : vector<2x32xf32>
    %77 = arith.addf %73, %76 : vector<2x32xf32>
    %78 = math.tanh %77 : vector<2x32xf32>
    %cst_29 = arith.constant 1.000000e+00 : f32
    %79 = vector.broadcast %cst_29 : f32 to vector<2x32xf32>
    %80 = arith.subf %79, %72 : vector<2x32xf32>
    %81 = arith.mulf %80, %78 : vector<2x32xf32>
    %82 = arith.mulf %72, %54 : vector<2x32xf32>
    %83 = arith.addf %81, %82 : vector<2x32xf32>
    %84 = vector.extract_strided_slice %44 {offsets = [0, 0], sizes = [2, 32], strides = [1, 1]} : vector<16x32xf32> to vector<2x32xf32>
    %85 = tpu.concatenate %83, %84 in 1 : vector<2x32xf32>, vector<2x32xf32> -> vector<2x64xf32>
    %c0_30 = arith.constant 0 : index
    %c0_31 = arith.constant 0 : index
    %86 = vector.load %arg6[%c0_30, %c0_31] : memref<520x16xf32, #tpu.memory_space<vmem>>, vector<64x16xf32>
    %cst_32 = arith.constant dense<0.000000e+00> : vector<2x16xf32>
    %87 = tpu.matmul %85, %86, %cst_32 {dimension_numbers = #tpu.dot_dimension_numbers<[1], [0], [0], [1], [0, 0, 1, 1], [], []>} : vector<2x64xf32>, vector<64x16xf32>, vector<2x16xf32> -> vector<2x16xf32>
    %88 = arith.addf %55, %87 : vector<2x16xf32>
    %cst_33 = arith.constant dense<0.000000e+00> : vector<2x96xf32>
    %89 = tpu.matmul %83, %46, %cst_33 {dimension_numbers = #tpu.dot_dimension_numbers<[1], [0], [0], [1], [0, 0, 1, 1], [], []>} : vector<2x32xf32>, vector<32x96xf32>, vector<2x96xf32> -> vector<2x96xf32>
    %90 = vector.extract_strided_slice %50 {offsets = [2, 0], sizes = [2, 32], strides = [1, 1]} : vector<16x96xf32> to vector<2x32xf32>
    %91 = vector.extract_strided_slice %89 {offsets = [0, 0], sizes = [2, 32], strides = [1, 1]} : vector<2x96xf32> to vector<2x32xf32>
    %92 = arith.addf %90, %91 : vector<2x32xf32>
    %93 = arith.negf %92 : vector<2x32xf32>
    %94 = math.exp %93 : vector<2x32xf32>
    %cst_34 = arith.constant 1.000000e+00 : f32
    %95 = vector.broadcast %cst_34 : f32 to vector<2x32xf32>
    %96 = arith.addf %95, %94 : vector<2x32xf32>
    %97 = arith.divf %95, %96 : vector<2x32xf32>
    %98 = vector.extract_strided_slice %50 {offsets = [2, 32], sizes = [2, 32], strides = [1, 1]} : vector<16x96xf32> to vector<2x32xf32>
    %99 = vector.extract_strided_slice %89 {offsets = [0, 32], sizes = [2, 32], strides = [1, 1]} : vector<2x96xf32> to vector<2x32xf32>
    %100 = arith.addf %98, %99 : vector<2x32xf32>
    %101 = arith.negf %100 : vector<2x32xf32>
    %102 = math.exp %101 : vector<2x32xf32>
    %cst_35 = arith.constant 1.000000e+00 : f32
    %103 = vector.broadcast %cst_35 : f32 to vector<2x32xf32>
    %104 = arith.addf %103, %102 : vector<2x32xf32>
    %105 = arith.divf %103, %104 : vector<2x32xf32>
    %106 = vector.extract_strided_slice %50 {offsets = [2, 64], sizes = [2, 32], strides = [1, 1]} : vector<16x96xf32> to vector<2x32xf32>
    %107 = vector.extract_strided_slice %89 {offsets = [0, 64], sizes = [2, 32], strides = [1, 1]} : vector<2x96xf32> to vector<2x32xf32>
    %108 = arith.addf %107, %53 : vector<2x32xf32>
    %109 = arith.mulf %97, %108 : vector<2x32xf32>
    %110 = arith.addf %106, %109 : vector<2x32xf32>
    %111 = math.tanh %110 : vector<2x32xf32>
    %cst_36 = arith.constant 1.000000e+00 : f32
    %112 = vector.broadcast %cst_36 : f32 to vector<2x32xf32>
    %113 = arith.subf %112, %105 : vector<2x32xf32>
    %114 = arith.mulf %113, %111 : vector<2x32xf32>
    %115 = arith.mulf %105, %83 : vector<2x32xf32>
    %116 = arith.addf %114, %115 : vector<2x32xf32>
    %117 = vector.extract_strided_slice %44 {offsets = [2, 0], sizes = [2, 32], strides = [1, 1]} : vector<16x32xf32> to vector<2x32xf32>
    %118 = tpu.concatenate %116, %117 in 1 : vector<2x32xf32>, vector<2x32xf32> -> vector<2x64xf32>
    %c64 = arith.constant 64 : index
    %c0_37 = arith.constant 0 : index
    %119 = vector.load %arg6[%c64, %c0_37] : memref<520x16xf32, #tpu.memory_space<vmem>>, vector<64x16xf32>
    %cst_38 = arith.constant dense<0.000000e+00> : vector<2x16xf32>
    %120 = tpu.matmul %118, %119, %cst_38 {dimension_numbers = #tpu.dot_dimension_numbers<[1], [0], [0], [1], [0, 0, 1, 1], [], []>} : vector<2x64xf32>, vector<64x16xf32>, vector<2x16xf32> -> vector<2x16xf32>
    %121 = arith.addf %88, %120 : vector<2x16xf32>
    %cst_39 = arith.constant dense<0.000000e+00> : vector<2x96xf32>
    %122 = tpu.matmul %116, %46, %cst_39 {dimension_numbers = #tpu.dot_dimension_numbers<[1], [0], [0], [1], [0, 0, 1, 1], [], []>} : vector<2x32xf32>, vector<32x96xf32>, vector<2x96xf32> -> vector<2x96xf32>
    %123 = vector.extract_strided_slice %50 {offsets = [4, 0], sizes = [2, 32], strides = [1, 1]} : vector<16x96xf32> to vector<2x32xf32>
    %124 = vector.extract_strided_slice %122 {offsets = [0, 0], sizes = [2, 32], strides = [1, 1]} : vector<2x96xf32> to vector<2x32xf32>
    %125 = arith.addf %123, %124 : vector<2x32xf32>
    %126 = arith.negf %125 : vector<2x32xf32>
    %127 = math.exp %126 : vector<2x32xf32>
    %cst_40 = arith.constant 1.000000e+00 : f32
    %128 = vector.broadcast %cst_40 : f32 to vector<2x32xf32>
    %129 = arith.addf %128, %127 : vector<2x32xf32>
    %130 = arith.divf %128, %129 : vector<2x32xf32>
    %131 = vector.extract_strided_slice %50 {offsets = [4, 32], sizes = [2, 32], strides = [1, 1]} : vector<16x96xf32> to vector<2x32xf32>
    %132 = vector.extract_strided_slice %122 {offsets = [0, 32], sizes = [2, 32], strides = [1, 1]} : vector<2x96xf32> to vector<2x32xf32>
    %133 = arith.addf %131, %132 : vector<2x32xf32>
    %134 = arith.negf %133 : vector<2x32xf32>
    %135 = math.exp %134 : vector<2x32xf32>
    %cst_41 = arith.constant 1.000000e+00 : f32
    %136 = vector.broadcast %cst_41 : f32 to vector<2x32xf32>
    %137 = arith.addf %136, %135 : vector<2x32xf32>
    %138 = arith.divf %136, %137 : vector<2x32xf32>
    %139 = vector.extract_strided_slice %50 {offsets = [4, 64], sizes = [2, 32], strides = [1, 1]} : vector<16x96xf32> to vector<2x32xf32>
    %140 = vector.extract_strided_slice %122 {offsets = [0, 64], sizes = [2, 32], strides = [1, 1]} : vector<2x96xf32> to vector<2x32xf32>
    %141 = arith.addf %140, %53 : vector<2x32xf32>
    %142 = arith.mulf %130, %141 : vector<2x32xf32>
    %143 = arith.addf %139, %142 : vector<2x32xf32>
    %144 = math.tanh %143 : vector<2x32xf32>
    %cst_42 = arith.constant 1.000000e+00 : f32
    %145 = vector.broadcast %cst_42 : f32 to vector<2x32xf32>
    %146 = arith.subf %145, %138 : vector<2x32xf32>
    %147 = arith.mulf %146, %144 : vector<2x32xf32>
    %148 = arith.mulf %138, %116 : vector<2x32xf32>
    %149 = arith.addf %147, %148 : vector<2x32xf32>
    %150 = vector.extract_strided_slice %44 {offsets = [4, 0], sizes = [2, 32], strides = [1, 1]} : vector<16x32xf32> to vector<2x32xf32>
    %151 = tpu.concatenate %149, %150 in 1 : vector<2x32xf32>, vector<2x32xf32> -> vector<2x64xf32>
    %c128 = arith.constant 128 : index
    %c0_43 = arith.constant 0 : index
    %152 = vector.load %arg6[%c128, %c0_43] : memref<520x16xf32, #tpu.memory_space<vmem>>, vector<64x16xf32>
    %cst_44 = arith.constant dense<0.000000e+00> : vector<2x16xf32>
    %153 = tpu.matmul %151, %152, %cst_44 {dimension_numbers = #tpu.dot_dimension_numbers<[1], [0], [0], [1], [0, 0, 1, 1], [], []>} : vector<2x64xf32>, vector<64x16xf32>, vector<2x16xf32> -> vector<2x16xf32>
    %154 = arith.addf %121, %153 : vector<2x16xf32>
    %cst_45 = arith.constant dense<0.000000e+00> : vector<2x96xf32>
    %155 = tpu.matmul %149, %46, %cst_45 {dimension_numbers = #tpu.dot_dimension_numbers<[1], [0], [0], [1], [0, 0, 1, 1], [], []>} : vector<2x32xf32>, vector<32x96xf32>, vector<2x96xf32> -> vector<2x96xf32>
    %156 = vector.extract_strided_slice %50 {offsets = [6, 0], sizes = [2, 32], strides = [1, 1]} : vector<16x96xf32> to vector<2x32xf32>
    %157 = vector.extract_strided_slice %155 {offsets = [0, 0], sizes = [2, 32], strides = [1, 1]} : vector<2x96xf32> to vector<2x32xf32>
    %158 = arith.addf %156, %157 : vector<2x32xf32>
    %159 = arith.negf %158 : vector<2x32xf32>
    %160 = math.exp %159 : vector<2x32xf32>
    %cst_46 = arith.constant 1.000000e+00 : f32
    %161 = vector.broadcast %cst_46 : f32 to vector<2x32xf32>
    %162 = arith.addf %161, %160 : vector<2x32xf32>
    %163 = arith.divf %161, %162 : vector<2x32xf32>
    %164 = vector.extract_strided_slice %50 {offsets = [6, 32], sizes = [2, 32], strides = [1, 1]} : vector<16x96xf32> to vector<2x32xf32>
    %165 = vector.extract_strided_slice %155 {offsets = [0, 32], sizes = [2, 32], strides = [1, 1]} : vector<2x96xf32> to vector<2x32xf32>
    %166 = arith.addf %164, %165 : vector<2x32xf32>
    %167 = arith.negf %166 : vector<2x32xf32>
    %168 = math.exp %167 : vector<2x32xf32>
    %cst_47 = arith.constant 1.000000e+00 : f32
    %169 = vector.broadcast %cst_47 : f32 to vector<2x32xf32>
    %170 = arith.addf %169, %168 : vector<2x32xf32>
    %171 = arith.divf %169, %170 : vector<2x32xf32>
    %172 = vector.extract_strided_slice %50 {offsets = [6, 64], sizes = [2, 32], strides = [1, 1]} : vector<16x96xf32> to vector<2x32xf32>
    %173 = vector.extract_strided_slice %155 {offsets = [0, 64], sizes = [2, 32], strides = [1, 1]} : vector<2x96xf32> to vector<2x32xf32>
    %174 = arith.addf %173, %53 : vector<2x32xf32>
    %175 = arith.mulf %163, %174 : vector<2x32xf32>
    %176 = arith.addf %172, %175 : vector<2x32xf32>
    %177 = math.tanh %176 : vector<2x32xf32>
    %cst_48 = arith.constant 1.000000e+00 : f32
    %178 = vector.broadcast %cst_48 : f32 to vector<2x32xf32>
    %179 = arith.subf %178, %171 : vector<2x32xf32>
    %180 = arith.mulf %179, %177 : vector<2x32xf32>
    %181 = arith.mulf %171, %149 : vector<2x32xf32>
    %182 = arith.addf %180, %181 : vector<2x32xf32>
    %183 = vector.extract_strided_slice %44 {offsets = [6, 0], sizes = [2, 32], strides = [1, 1]} : vector<16x32xf32> to vector<2x32xf32>
    %184 = tpu.concatenate %182, %183 in 1 : vector<2x32xf32>, vector<2x32xf32> -> vector<2x64xf32>
    %c192 = arith.constant 192 : index
    %c0_49 = arith.constant 0 : index
    %185 = vector.load %arg6[%c192, %c0_49] : memref<520x16xf32, #tpu.memory_space<vmem>>, vector<64x16xf32>
    %cst_50 = arith.constant dense<0.000000e+00> : vector<2x16xf32>
    %186 = tpu.matmul %184, %185, %cst_50 {dimension_numbers = #tpu.dot_dimension_numbers<[1], [0], [0], [1], [0, 0, 1, 1], [], []>} : vector<2x64xf32>, vector<64x16xf32>, vector<2x16xf32> -> vector<2x16xf32>
    %187 = arith.addf %154, %186 : vector<2x16xf32>
    %cst_51 = arith.constant dense<0.000000e+00> : vector<2x96xf32>
    %188 = tpu.matmul %182, %46, %cst_51 {dimension_numbers = #tpu.dot_dimension_numbers<[1], [0], [0], [1], [0, 0, 1, 1], [], []>} : vector<2x32xf32>, vector<32x96xf32>, vector<2x96xf32> -> vector<2x96xf32>
    %189 = vector.extract_strided_slice %50 {offsets = [8, 0], sizes = [2, 32], strides = [1, 1]} : vector<16x96xf32> to vector<2x32xf32>
    %190 = vector.extract_strided_slice %188 {offsets = [0, 0], sizes = [2, 32], strides = [1, 1]} : vector<2x96xf32> to vector<2x32xf32>
    %191 = arith.addf %189, %190 : vector<2x32xf32>
    %192 = arith.negf %191 : vector<2x32xf32>
    %193 = math.exp %192 : vector<2x32xf32>
    %cst_52 = arith.constant 1.000000e+00 : f32
    %194 = vector.broadcast %cst_52 : f32 to vector<2x32xf32>
    %195 = arith.addf %194, %193 : vector<2x32xf32>
    %196 = arith.divf %194, %195 : vector<2x32xf32>
    %197 = vector.extract_strided_slice %50 {offsets = [8, 32], sizes = [2, 32], strides = [1, 1]} : vector<16x96xf32> to vector<2x32xf32>
    %198 = vector.extract_strided_slice %188 {offsets = [0, 32], sizes = [2, 32], strides = [1, 1]} : vector<2x96xf32> to vector<2x32xf32>
    %199 = arith.addf %197, %198 : vector<2x32xf32>
    %200 = arith.negf %199 : vector<2x32xf32>
    %201 = math.exp %200 : vector<2x32xf32>
    %cst_53 = arith.constant 1.000000e+00 : f32
    %202 = vector.broadcast %cst_53 : f32 to vector<2x32xf32>
    %203 = arith.addf %202, %201 : vector<2x32xf32>
    %204 = arith.divf %202, %203 : vector<2x32xf32>
    %205 = vector.extract_strided_slice %50 {offsets = [8, 64], sizes = [2, 32], strides = [1, 1]} : vector<16x96xf32> to vector<2x32xf32>
    %206 = vector.extract_strided_slice %188 {offsets = [0, 64], sizes = [2, 32], strides = [1, 1]} : vector<2x96xf32> to vector<2x32xf32>
    %207 = arith.addf %206, %53 : vector<2x32xf32>
    %208 = arith.mulf %196, %207 : vector<2x32xf32>
    %209 = arith.addf %205, %208 : vector<2x32xf32>
    %210 = math.tanh %209 : vector<2x32xf32>
    %cst_54 = arith.constant 1.000000e+00 : f32
    %211 = vector.broadcast %cst_54 : f32 to vector<2x32xf32>
    %212 = arith.subf %211, %204 : vector<2x32xf32>
    %213 = arith.mulf %212, %210 : vector<2x32xf32>
    %214 = arith.mulf %204, %182 : vector<2x32xf32>
    %215 = arith.addf %213, %214 : vector<2x32xf32>
    %216 = vector.extract_strided_slice %44 {offsets = [8, 0], sizes = [2, 32], strides = [1, 1]} : vector<16x32xf32> to vector<2x32xf32>
    %217 = tpu.concatenate %215, %216 in 1 : vector<2x32xf32>, vector<2x32xf32> -> vector<2x64xf32>
    %c256 = arith.constant 256 : index
    %c0_55 = arith.constant 0 : index
    %218 = vector.load %arg6[%c256, %c0_55] : memref<520x16xf32, #tpu.memory_space<vmem>>, vector<64x16xf32>
    %cst_56 = arith.constant dense<0.000000e+00> : vector<2x16xf32>
    %219 = tpu.matmul %217, %218, %cst_56 {dimension_numbers = #tpu.dot_dimension_numbers<[1], [0], [0], [1], [0, 0, 1, 1], [], []>} : vector<2x64xf32>, vector<64x16xf32>, vector<2x16xf32> -> vector<2x16xf32>
    %220 = arith.addf %187, %219 : vector<2x16xf32>
    %cst_57 = arith.constant dense<0.000000e+00> : vector<2x96xf32>
    %221 = tpu.matmul %215, %46, %cst_57 {dimension_numbers = #tpu.dot_dimension_numbers<[1], [0], [0], [1], [0, 0, 1, 1], [], []>} : vector<2x32xf32>, vector<32x96xf32>, vector<2x96xf32> -> vector<2x96xf32>
    %222 = vector.extract_strided_slice %50 {offsets = [10, 0], sizes = [2, 32], strides = [1, 1]} : vector<16x96xf32> to vector<2x32xf32>
    %223 = vector.extract_strided_slice %221 {offsets = [0, 0], sizes = [2, 32], strides = [1, 1]} : vector<2x96xf32> to vector<2x32xf32>
    %224 = arith.addf %222, %223 : vector<2x32xf32>
    %225 = arith.negf %224 : vector<2x32xf32>
    %226 = math.exp %225 : vector<2x32xf32>
    %cst_58 = arith.constant 1.000000e+00 : f32
    %227 = vector.broadcast %cst_58 : f32 to vector<2x32xf32>
    %228 = arith.addf %227, %226 : vector<2x32xf32>
    %229 = arith.divf %227, %228 : vector<2x32xf32>
    %230 = vector.extract_strided_slice %50 {offsets = [10, 32], sizes = [2, 32], strides = [1, 1]} : vector<16x96xf32> to vector<2x32xf32>
    %231 = vector.extract_strided_slice %221 {offsets = [0, 32], sizes = [2, 32], strides = [1, 1]} : vector<2x96xf32> to vector<2x32xf32>
    %232 = arith.addf %230, %231 : vector<2x32xf32>
    %233 = arith.negf %232 : vector<2x32xf32>
    %234 = math.exp %233 : vector<2x32xf32>
    %cst_59 = arith.constant 1.000000e+00 : f32
    %235 = vector.broadcast %cst_59 : f32 to vector<2x32xf32>
    %236 = arith.addf %235, %234 : vector<2x32xf32>
    %237 = arith.divf %235, %236 : vector<2x32xf32>
    %238 = vector.extract_strided_slice %50 {offsets = [10, 64], sizes = [2, 32], strides = [1, 1]} : vector<16x96xf32> to vector<2x32xf32>
    %239 = vector.extract_strided_slice %221 {offsets = [0, 64], sizes = [2, 32], strides = [1, 1]} : vector<2x96xf32> to vector<2x32xf32>
    %240 = arith.addf %239, %53 : vector<2x32xf32>
    %241 = arith.mulf %229, %240 : vector<2x32xf32>
    %242 = arith.addf %238, %241 : vector<2x32xf32>
    %243 = math.tanh %242 : vector<2x32xf32>
    %cst_60 = arith.constant 1.000000e+00 : f32
    %244 = vector.broadcast %cst_60 : f32 to vector<2x32xf32>
    %245 = arith.subf %244, %237 : vector<2x32xf32>
    %246 = arith.mulf %245, %243 : vector<2x32xf32>
    %247 = arith.mulf %237, %215 : vector<2x32xf32>
    %248 = arith.addf %246, %247 : vector<2x32xf32>
    %249 = vector.extract_strided_slice %44 {offsets = [10, 0], sizes = [2, 32], strides = [1, 1]} : vector<16x32xf32> to vector<2x32xf32>
    %250 = tpu.concatenate %248, %249 in 1 : vector<2x32xf32>, vector<2x32xf32> -> vector<2x64xf32>
    %c320 = arith.constant 320 : index
    %c0_61 = arith.constant 0 : index
    %251 = vector.load %arg6[%c320, %c0_61] : memref<520x16xf32, #tpu.memory_space<vmem>>, vector<64x16xf32>
    %cst_62 = arith.constant dense<0.000000e+00> : vector<2x16xf32>
    %252 = tpu.matmul %250, %251, %cst_62 {dimension_numbers = #tpu.dot_dimension_numbers<[1], [0], [0], [1], [0, 0, 1, 1], [], []>} : vector<2x64xf32>, vector<64x16xf32>, vector<2x16xf32> -> vector<2x16xf32>
    %253 = arith.addf %220, %252 : vector<2x16xf32>
    %cst_63 = arith.constant dense<0.000000e+00> : vector<2x96xf32>
    %254 = tpu.matmul %248, %46, %cst_63 {dimension_numbers = #tpu.dot_dimension_numbers<[1], [0], [0], [1], [0, 0, 1, 1], [], []>} : vector<2x32xf32>, vector<32x96xf32>, vector<2x96xf32> -> vector<2x96xf32>
    %255 = vector.extract_strided_slice %50 {offsets = [12, 0], sizes = [2, 32], strides = [1, 1]} : vector<16x96xf32> to vector<2x32xf32>
    %256 = vector.extract_strided_slice %254 {offsets = [0, 0], sizes = [2, 32], strides = [1, 1]} : vector<2x96xf32> to vector<2x32xf32>
    %257 = arith.addf %255, %256 : vector<2x32xf32>
    %258 = arith.negf %257 : vector<2x32xf32>
    %259 = math.exp %258 : vector<2x32xf32>
    %cst_64 = arith.constant 1.000000e+00 : f32
    %260 = vector.broadcast %cst_64 : f32 to vector<2x32xf32>
    %261 = arith.addf %260, %259 : vector<2x32xf32>
    %262 = arith.divf %260, %261 : vector<2x32xf32>
    %263 = vector.extract_strided_slice %50 {offsets = [12, 32], sizes = [2, 32], strides = [1, 1]} : vector<16x96xf32> to vector<2x32xf32>
    %264 = vector.extract_strided_slice %254 {offsets = [0, 32], sizes = [2, 32], strides = [1, 1]} : vector<2x96xf32> to vector<2x32xf32>
    %265 = arith.addf %263, %264 : vector<2x32xf32>
    %266 = arith.negf %265 : vector<2x32xf32>
    %267 = math.exp %266 : vector<2x32xf32>
    %cst_65 = arith.constant 1.000000e+00 : f32
    %268 = vector.broadcast %cst_65 : f32 to vector<2x32xf32>
    %269 = arith.addf %268, %267 : vector<2x32xf32>
    %270 = arith.divf %268, %269 : vector<2x32xf32>
    %271 = vector.extract_strided_slice %50 {offsets = [12, 64], sizes = [2, 32], strides = [1, 1]} : vector<16x96xf32> to vector<2x32xf32>
    %272 = vector.extract_strided_slice %254 {offsets = [0, 64], sizes = [2, 32], strides = [1, 1]} : vector<2x96xf32> to vector<2x32xf32>
    %273 = arith.addf %272, %53 : vector<2x32xf32>
    %274 = arith.mulf %262, %273 : vector<2x32xf32>
    %275 = arith.addf %271, %274 : vector<2x32xf32>
    %276 = math.tanh %275 : vector<2x32xf32>
    %cst_66 = arith.constant 1.000000e+00 : f32
    %277 = vector.broadcast %cst_66 : f32 to vector<2x32xf32>
    %278 = arith.subf %277, %270 : vector<2x32xf32>
    %279 = arith.mulf %278, %276 : vector<2x32xf32>
    %280 = arith.mulf %270, %248 : vector<2x32xf32>
    %281 = arith.addf %279, %280 : vector<2x32xf32>
    %282 = vector.extract_strided_slice %44 {offsets = [12, 0], sizes = [2, 32], strides = [1, 1]} : vector<16x32xf32> to vector<2x32xf32>
    %283 = tpu.concatenate %281, %282 in 1 : vector<2x32xf32>, vector<2x32xf32> -> vector<2x64xf32>
    %c384 = arith.constant 384 : index
    %c0_67 = arith.constant 0 : index
    %284 = vector.load %arg6[%c384, %c0_67] : memref<520x16xf32, #tpu.memory_space<vmem>>, vector<64x16xf32>
    %cst_68 = arith.constant dense<0.000000e+00> : vector<2x16xf32>
    %285 = tpu.matmul %283, %284, %cst_68 {dimension_numbers = #tpu.dot_dimension_numbers<[1], [0], [0], [1], [0, 0, 1, 1], [], []>} : vector<2x64xf32>, vector<64x16xf32>, vector<2x16xf32> -> vector<2x16xf32>
    %286 = arith.addf %253, %285 : vector<2x16xf32>
    %cst_69 = arith.constant dense<0.000000e+00> : vector<2x96xf32>
    %287 = tpu.matmul %281, %46, %cst_69 {dimension_numbers = #tpu.dot_dimension_numbers<[1], [0], [0], [1], [0, 0, 1, 1], [], []>} : vector<2x32xf32>, vector<32x96xf32>, vector<2x96xf32> -> vector<2x96xf32>
    %288 = vector.extract_strided_slice %50 {offsets = [14, 0], sizes = [2, 32], strides = [1, 1]} : vector<16x96xf32> to vector<2x32xf32>
    %289 = vector.extract_strided_slice %287 {offsets = [0, 0], sizes = [2, 32], strides = [1, 1]} : vector<2x96xf32> to vector<2x32xf32>
    %290 = arith.addf %288, %289 : vector<2x32xf32>
    %291 = arith.negf %290 : vector<2x32xf32>
    %292 = math.exp %291 : vector<2x32xf32>
    %cst_70 = arith.constant 1.000000e+00 : f32
    %293 = vector.broadcast %cst_70 : f32 to vector<2x32xf32>
    %294 = arith.addf %293, %292 : vector<2x32xf32>
    %295 = arith.divf %293, %294 : vector<2x32xf32>
    %296 = vector.extract_strided_slice %50 {offsets = [14, 32], sizes = [2, 32], strides = [1, 1]} : vector<16x96xf32> to vector<2x32xf32>
    %297 = vector.extract_strided_slice %287 {offsets = [0, 32], sizes = [2, 32], strides = [1, 1]} : vector<2x96xf32> to vector<2x32xf32>
    %298 = arith.addf %296, %297 : vector<2x32xf32>
    %299 = arith.negf %298 : vector<2x32xf32>
    %300 = math.exp %299 : vector<2x32xf32>
    %cst_71 = arith.constant 1.000000e+00 : f32
    %301 = vector.broadcast %cst_71 : f32 to vector<2x32xf32>
    %302 = arith.addf %301, %300 : vector<2x32xf32>
    %303 = arith.divf %301, %302 : vector<2x32xf32>
    %304 = vector.extract_strided_slice %50 {offsets = [14, 64], sizes = [2, 32], strides = [1, 1]} : vector<16x96xf32> to vector<2x32xf32>
    %305 = vector.extract_strided_slice %287 {offsets = [0, 64], sizes = [2, 32], strides = [1, 1]} : vector<2x96xf32> to vector<2x32xf32>
    %306 = arith.addf %305, %53 : vector<2x32xf32>
    %307 = arith.mulf %295, %306 : vector<2x32xf32>
    %308 = arith.addf %304, %307 : vector<2x32xf32>
    %309 = math.tanh %308 : vector<2x32xf32>
    %cst_72 = arith.constant 1.000000e+00 : f32
    %310 = vector.broadcast %cst_72 : f32 to vector<2x32xf32>
    %311 = arith.subf %310, %303 : vector<2x32xf32>
    %312 = arith.mulf %311, %309 : vector<2x32xf32>
    %313 = arith.mulf %303, %281 : vector<2x32xf32>
    %314 = arith.addf %312, %313 : vector<2x32xf32>
    %315 = vector.extract_strided_slice %44 {offsets = [14, 0], sizes = [2, 32], strides = [1, 1]} : vector<16x32xf32> to vector<2x32xf32>
    %316 = tpu.concatenate %314, %315 in 1 : vector<2x32xf32>, vector<2x32xf32> -> vector<2x64xf32>
    %c448 = arith.constant 448 : index
    %c0_73 = arith.constant 0 : index
    %317 = vector.load %arg6[%c448, %c0_73] : memref<520x16xf32, #tpu.memory_space<vmem>>, vector<64x16xf32>
    %cst_74 = arith.constant dense<0.000000e+00> : vector<2x16xf32>
    %318 = tpu.matmul %316, %317, %cst_74 {dimension_numbers = #tpu.dot_dimension_numbers<[1], [0], [0], [1], [0, 0, 1, 1], [], []>} : vector<2x64xf32>, vector<64x16xf32>, vector<2x16xf32> -> vector<2x16xf32>
    %319 = arith.addf %286, %318 : vector<2x16xf32>
    %c0_75 = arith.constant 0 : index
    %c0_76 = arith.constant 0 : index
    %320 = vector.load %arg4[%c0_75, %c0_76] : memref<2x776xf32, #tpu.memory_space<vmem>>, vector<2x512xf32>
    %c0_77 = arith.constant 0 : index
    %c512 = arith.constant 512 : index
    %321 = vector.load %arg4[%c0_77, %c512] : memref<2x776xf32, #tpu.memory_space<vmem>>, vector<2x128xf32>
    %c0_78 = arith.constant 0 : index
    %c640 = arith.constant 640 : index
    %322 = vector.load %arg4[%c0_78, %c640] : memref<2x776xf32, #tpu.memory_space<vmem>>, vector<2x128xf32>
    %c0_79 = arith.constant 0 : index
    %c768 = arith.constant 768 : index
    %323 = vector.load %arg4[%c0_79, %c768] : memref<2x776xf32, #tpu.memory_space<vmem>>, vector<2x8xf32>
    %cst_80 = arith.constant 1.000000e-01 : f32
    %324 = vector.broadcast %cst_80 : f32 to vector<2x1xf32>
    %325 = arith.mulf %324, %13 : vector<2x1xf32>
    %326 = vector.broadcast %325 : vector<2x1xf32> to vector<2x16xf32>
    %327 = arith.mulf %326, %319 : vector<2x16xf32>
    %c0_81 = arith.constant 0 : index
    %c0_82 = arith.constant 0 : index
    %328 = vector.load %arg6[%c0_81, %c0_82] : memref<520x16xf32, #tpu.memory_space<vmem>>, vector<512x16xf32>
    %cst_83 = arith.constant dense<0.000000e+00> : vector<2x16xf32>
    %329 = tpu.matmul %320, %328, %cst_83 {dimension_numbers = #tpu.dot_dimension_numbers<[1], [0], [0], [1], [0, 0, 1, 1], [], []>} : vector<2x512xf32>, vector<512x16xf32>, vector<2x16xf32> -> vector<2x16xf32>
    %330 = vector.broadcast %26 : vector<2x1xf32> to vector<2x16xf32>
    %331 = arith.mulf %330, %329 : vector<2x16xf32>
    %332 = arith.addf %327, %331 : vector<2x16xf32>
    %c512_84 = arith.constant 512 : index
    %c0_85 = arith.constant 0 : index
    %333 = vector.load %arg6[%c512_84, %c0_85] : memref<520x16xf32, #tpu.memory_space<vmem>>, vector<1x16xf32>
    %334 = vector.broadcast %333 : vector<1x16xf32> to vector<2x16xf32>
    %335 = arith.addf %332, %334 : vector<2x16xf32>
    %336 = vector.extract_strided_slice %335 {offsets = [0, 0], sizes = [2, 8], strides = [1, 1]} : vector<2x16xf32> to vector<2x8xf32>
    %337 = vector.extract_strided_slice %335 {offsets = [0, 8], sizes = [2, 8], strides = [1, 1]} : vector<2x16xf32> to vector<2x8xf32>
    %cst_86 = arith.constant 5.000000e-01 : f32
    %338 = vector.broadcast %cst_86 : f32 to vector<2x8xf32>
    %339 = arith.mulf %338, %337 : vector<2x8xf32>
    %340 = math.exp %339 : vector<2x8xf32>
    %341 = arith.mulf %340, %323 : vector<2x8xf32>
    %342 = arith.addf %336, %341 : vector<2x8xf32>
    %c0_87 = arith.constant 0 : index
    %c0_88 = arith.constant 0 : index
    %343 = vector.load %arg3[%c0_87, %c0_88] : memref<2x128xf32, #tpu.memory_space<vmem>>, vector<2x128xf32>
    %cst_89 = arith.constant 1.000000e-01 : f32
    %344 = vector.broadcast %cst_89 : f32 to vector<2x128xf32>
    %345 = arith.mulf %344, %343 : vector<2x128xf32>
    %346 = vector.broadcast %13 : vector<2x1xf32> to vector<2x128xf32>
    %347 = arith.mulf %346, %345 : vector<2x128xf32>
    %348 = vector.broadcast %26 : vector<2x1xf32> to vector<2x128xf32>
    %349 = arith.mulf %348, %321 : vector<2x128xf32>
    %350 = arith.addf %347, %349 : vector<2x128xf32>
    %c0_90 = arith.constant 0 : index
    %c0_91 = arith.constant 0 : index
    %351 = vector.load %arg7[%c0_90, %c0_91] : memref<312x256xf32, #tpu.memory_space<vmem>>, vector<8x256xf32>
    %cst_92 = arith.constant dense<0.000000e+00> : vector<2x256xf32>
    %352 = tpu.matmul %342, %351, %cst_92 {dimension_numbers = #tpu.dot_dimension_numbers<[1], [0], [0], [1], [0, 0, 1, 1], [], []>} : vector<2x8xf32>, vector<8x256xf32>, vector<2x256xf32> -> vector<2x256xf32>
    %c8 = arith.constant 8 : index
    %c0_93 = arith.constant 0 : index
    %353 = vector.load %arg7[%c8, %c0_93] : memref<312x256xf32, #tpu.memory_space<vmem>>, vector<1x256xf32>
    %354 = vector.broadcast %353 : vector<1x256xf32> to vector<2x256xf32>
    %355 = arith.addf %352, %354 : vector<2x256xf32>
    %356 = vector.extract_strided_slice %355 {offsets = [0, 0], sizes = [2, 128], strides = [1, 1]} : vector<2x256xf32> to vector<2x128xf32>
    %357 = vector.extract_strided_slice %355 {offsets = [0, 128], sizes = [2, 128], strides = [1, 1]} : vector<2x256xf32> to vector<2x128xf32>
    %358 = vector.extract_strided_slice %336 {offsets = [0, 0], sizes = [1, 8], strides = [1, 1]} : vector<2x8xf32> to vector<1x8xf32>
    %359 = vector.extract_strided_slice %337 {offsets = [0, 0], sizes = [1, 8], strides = [1, 1]} : vector<2x8xf32> to vector<1x8xf32>
    %360 = vector.broadcast %358 : vector<1x8xf32> to vector<2x8xf32>
    %361 = arith.subf %342, %360 : vector<2x8xf32>
    %362 = arith.mulf %361, %361 : vector<2x8xf32>
    %cst_94 = arith.constant 0.000000e+00 : f32
    %363 = vector.broadcast %cst_94 : f32 to vector<1x8xf32>
    %364 = arith.subf %363, %359 : vector<1x8xf32>
    %365 = math.exp %364 : vector<1x8xf32>
    %366 = vector.broadcast %365 : vector<1x8xf32> to vector<2x8xf32>
    %367 = arith.mulf %362, %366 : vector<2x8xf32>
    %368 = vector.broadcast %359 : vector<1x8xf32> to vector<2x8xf32>
    %369 = arith.addf %367, %368 : vector<2x8xf32>
    %cst_95 = arith.constant 1.83787704 : f32
    %370 = vector.broadcast %cst_95 : f32 to vector<2x8xf32>
    %371 = arith.addf %369, %370 : vector<2x8xf32>
    %cst_96 = arith.constant -5.000000e-01 : f32
    %372 = vector.broadcast %cst_96 : f32 to vector<2x8xf32>
    %373 = arith.mulf %372, %371 : vector<2x8xf32>
    %374 = vector.extract_strided_slice %336 {offsets = [1, 0], sizes = [1, 8], strides = [1, 1]} : vector<2x8xf32> to vector<1x8xf32>
    %375 = vector.extract_strided_slice %337 {offsets = [1, 0], sizes = [1, 8], strides = [1, 1]} : vector<2x8xf32> to vector<1x8xf32>
    %376 = vector.broadcast %374 : vector<1x8xf32> to vector<2x8xf32>
    %377 = arith.subf %342, %376 : vector<2x8xf32>
    %378 = arith.mulf %377, %377 : vector<2x8xf32>
    %cst_97 = arith.constant 0.000000e+00 : f32
    %379 = vector.broadcast %cst_97 : f32 to vector<1x8xf32>
    %380 = arith.subf %379, %375 : vector<1x8xf32>
    %381 = math.exp %380 : vector<1x8xf32>
    %382 = vector.broadcast %381 : vector<1x8xf32> to vector<2x8xf32>
    %383 = arith.mulf %378, %382 : vector<2x8xf32>
    %384 = vector.broadcast %375 : vector<1x8xf32> to vector<2x8xf32>
    %385 = arith.addf %383, %384 : vector<2x8xf32>
    %cst_98 = arith.constant 1.83787704 : f32
    %386 = vector.broadcast %cst_98 : f32 to vector<2x8xf32>
    %387 = arith.addf %385, %386 : vector<2x8xf32>
    %cst_99 = arith.constant -5.000000e-01 : f32
    %388 = vector.broadcast %cst_99 : f32 to vector<2x8xf32>
    %389 = arith.mulf %388, %387 : vector<2x8xf32>
    %cst_100 = arith.constant dense<0.000000e+00> : vector<2xf32>
    %390 = vector.multi_reduction <add>, %373, %cst_100 [1] : vector<2x8xf32> to vector<2xf32>
    %391 = vector.shape_cast %390 : vector<2xf32> to vector<2x1xf32>
    %cst_101 = arith.constant dense<0.000000e+00> : vector<2xf32>
    %392 = vector.multi_reduction <add>, %389, %cst_101 [1] : vector<2x8xf32> to vector<2xf32>
    %393 = vector.shape_cast %392 : vector<2xf32> to vector<2x1xf32>
    %394 = arith.maximumf %391, %393 : vector<2x1xf32>
    %395 = arith.subf %391, %394 : vector<2x1xf32>
    %396 = math.exp %395 : vector<2x1xf32>
    %cst_102 = arith.constant 0.000000e+00 : f32
    %397 = vector.broadcast %cst_102 : f32 to vector<2x1xf32>
    %398 = arith.addf %397, %396 : vector<2x1xf32>
    %399 = arith.subf %393, %394 : vector<2x1xf32>
    %400 = math.exp %399 : vector<2x1xf32>
    %401 = arith.addf %398, %400 : vector<2x1xf32>
    %402 = math.log %401 : vector<2x1xf32>
    %403 = arith.addf %394, %402 : vector<2x1xf32>
    %cst_103 = arith.constant 0.693147182 : f32
    %404 = vector.broadcast %cst_103 : f32 to vector<2x1xf32>
    %405 = arith.subf %403, %404 : vector<2x1xf32>
    %406 = arith.maximumf %373, %389 : vector<2x8xf32>
    %407 = arith.subf %373, %406 : vector<2x8xf32>
    %408 = math.exp %407 : vector<2x8xf32>
    %cst_104 = arith.constant 0.000000e+00 : f32
    %409 = vector.broadcast %cst_104 : f32 to vector<2x8xf32>
    %410 = arith.addf %409, %408 : vector<2x8xf32>
    %411 = arith.subf %389, %406 : vector<2x8xf32>
    %412 = math.exp %411 : vector<2x8xf32>
    %413 = arith.addf %410, %412 : vector<2x8xf32>
    %414 = math.log %413 : vector<2x8xf32>
    %415 = arith.addf %406, %414 : vector<2x8xf32>
    %cst_105 = arith.constant 0.693147182 : f32
    %416 = vector.broadcast %cst_105 : f32 to vector<2x8xf32>
    %417 = arith.subf %415, %416 : vector<2x8xf32>
    %cst_106 = arith.constant dense<0.000000e+00> : vector<2xf32>
    %418 = vector.multi_reduction <add>, %417, %cst_106 [1] : vector<2x8xf32> to vector<2xf32>
    %419 = vector.shape_cast %418 : vector<2xf32> to vector<2x1xf32>
    %420 = arith.subf %405, %419 : vector<2x1xf32>
    %421 = math.exp %357 : vector<2x128xf32>
    %422 = arith.mulf %421, %322 : vector<2x128xf32>
    %423 = arith.addf %356, %422 : vector<2x128xf32>
    %c16 = arith.constant 16 : index
    %c0_107 = arith.constant 0 : index
    %424 = vector.load %arg7[%c16, %c0_107] : memref<312x256xf32, #tpu.memory_space<vmem>>, vector<128x64xf32>
    %c208 = arith.constant 208 : index
    %c0_108 = arith.constant 0 : index
    %425 = vector.load %arg7[%c208, %c0_108] : memref<312x256xf32, #tpu.memory_space<vmem>>, vector<64x32xf32>
    %cst_109 = arith.constant dense<0.000000e+00> : vector<2x64xf32>
    %426 = tpu.matmul %423, %424, %cst_109 {dimension_numbers = #tpu.dot_dimension_numbers<[1], [0], [0], [1], [0, 0, 1, 1], [], []>} : vector<2x128xf32>, vector<128x64xf32>, vector<2x64xf32> -> vector<2x64xf32>
    %c304 = arith.constant 304 : index
    %c0_110 = arith.constant 0 : index
    %427 = vector.load %arg7[%c304, %c0_110] : memref<312x256xf32, #tpu.memory_space<vmem>>, vector<1x64xf32>
    %428 = vector.broadcast %427 : vector<1x64xf32> to vector<2x64xf32>
    %429 = arith.addf %426, %428 : vector<2x64xf32>
    %cst_111 = arith.constant 0.000000e+00 : f32
    %430 = vector.broadcast %cst_111 : f32 to vector<2x64xf32>
    %431 = arith.cmpf ogt, %429, %430 : vector<2x64xf32>
    %432 = math.exp %429 : vector<2x64xf32>
    %cst_112 = arith.constant 1.000000e+00 : f32
    %433 = vector.broadcast %cst_112 : f32 to vector<2x64xf32>
    %434 = arith.subf %432, %433 : vector<2x64xf32>
    %435 = arith.select %431, %429, %434 : vector<2x64xi1>, vector<2x64xf32>
    %cst_113 = arith.constant dense<0.000000e+00> : vector<2x32xf32>
    %436 = tpu.matmul %435, %425, %cst_113 {dimension_numbers = #tpu.dot_dimension_numbers<[1], [0], [0], [1], [0, 0, 1, 1], [], []>} : vector<2x64xf32>, vector<64x32xf32>, vector<2x32xf32> -> vector<2x32xf32>
    %c305 = arith.constant 305 : index
    %c0_114 = arith.constant 0 : index
    %437 = vector.load %arg7[%c305, %c0_114] : memref<312x256xf32, #tpu.memory_space<vmem>>, vector<1x32xf32>
    %438 = vector.broadcast %437 : vector<1x32xf32> to vector<2x32xf32>
    %439 = arith.addf %436, %438 : vector<2x32xf32>
    %cst_115 = arith.constant 0.000000e+00 : f32
    %440 = vector.broadcast %cst_115 : f32 to vector<2x32xf32>
    %441 = arith.cmpf ogt, %439, %440 : vector<2x32xf32>
    %442 = math.exp %439 : vector<2x32xf32>
    %cst_116 = arith.constant 1.000000e+00 : f32
    %443 = vector.broadcast %cst_116 : f32 to vector<2x32xf32>
    %444 = arith.subf %442, %443 : vector<2x32xf32>
    %445 = arith.select %441, %439, %444 : vector<2x32xi1>, vector<2x32xf32>
    %cst_117 = arith.constant 0.000000e+00 : f32
    %446 = vector.broadcast %cst_117 : f32 to vector<2x32xf32>
    %447 = arith.cmpf ogt, %439, %446 : vector<2x32xf32>
    %448 = math.exp %439 : vector<2x32xf32>
    %cst_118 = arith.constant 1.000000e+00 : f32
    %449 = vector.broadcast %cst_118 : f32 to vector<2x32xf32>
    %450 = arith.select %447, %449, %448 : vector<2x32xi1>, vector<2x32xf32>
    %451 = arith.mulf %445, %450 : vector<2x32xf32>
    %c272 = arith.constant 272 : index
    %c0_119 = arith.constant 0 : index
    %452 = vector.load %arg7[%c272, %c0_119] : memref<312x256xf32, #tpu.memory_space<vmem>>, vector<32x64xf32>
    %cst_120 = arith.constant dense<0.000000e+00> : vector<2x64xf32>
    %453 = tpu.matmul %451, %452, %cst_120 {dimension_numbers = #tpu.dot_dimension_numbers<[1], [0], [0], [1], [0, 0, 1, 1], [], []>} : vector<2x32xf32>, vector<32x64xf32>, vector<2x64xf32> -> vector<2x64xf32>
    %cst_121 = arith.constant 0.000000e+00 : f32
    %454 = vector.broadcast %cst_121 : f32 to vector<2x64xf32>
    %455 = arith.cmpf ogt, %429, %454 : vector<2x64xf32>
    %456 = math.exp %429 : vector<2x64xf32>
    %cst_122 = arith.constant 1.000000e+00 : f32
    %457 = vector.broadcast %cst_122 : f32 to vector<2x64xf32>
    %458 = arith.select %455, %457, %456 : vector<2x64xi1>, vector<2x64xf32>
    %459 = arith.mulf %453, %458 : vector<2x64xf32>
    %c144 = arith.constant 144 : index
    %c0_123 = arith.constant 0 : index
    %460 = vector.load %arg7[%c144, %c0_123] : memref<312x256xf32, #tpu.memory_space<vmem>>, vector<64x128xf32>
    %cst_124 = arith.constant dense<0.000000e+00> : vector<2x128xf32>
    %461 = tpu.matmul %459, %460, %cst_124 {dimension_numbers = #tpu.dot_dimension_numbers<[1], [0], [0], [1], [0, 0, 1, 1], [], []>} : vector<2x64xf32>, vector<64x128xf32>, vector<2x128xf32> -> vector<2x128xf32>
    %462 = arith.subf %343, %423 : vector<2x128xf32>
    %cst_125 = arith.constant 1.000000e-03 : f32
    %463 = vector.broadcast %cst_125 : f32 to vector<2x128xf32>
    %464 = arith.mulf %463, %461 : vector<2x128xf32>
    %465 = arith.addf %462, %464 : vector<2x128xf32>
    %466 = arith.mulf %465, %465 : vector<2x128xf32>
    %cst_126 = arith.constant dense<0.000000e+00> : vector<2xf32>
    %467 = vector.multi_reduction <add>, %466, %cst_126 [1] : vector<2x128xf32> to vector<2xf32>
    %468 = vector.shape_cast %467 : vector<2xf32> to vector<2x1xf32>
    %469 = arith.mulf %468, %39 : vector<2x1xf32>
    %cst_127 = arith.constant 0.000000e+00 : f32
    %470 = vector.broadcast %cst_127 : f32 to vector<2x118xf32>
    %471 = tpu.concatenate %342, %420, %469, %470 in 1 : vector<2x8xf32>, vector<2x1xf32>, vector<2x1xf32>, vector<2x118xf32> -> vector<2x128xf32>
    %472 = tpu.concatenate %356, %357, %350, %471 in 1 : vector<2x128xf32>, vector<2x128xf32>, vector<2x128xf32>, vector<2x128xf32> -> vector<2x512xf32>
    %c0_128 = arith.constant 0 : index
    %c0_129 = arith.constant 0 : index
    %473 = vector.load %arg8[%c0_128, %c0_129] : memref<2x512xf32, #tpu.memory_space<vmem>>, vector<2x512xf32>
    tpu.vector_store %arg8[%c0_128, %c0_129], %472 {strides = array<i32>} : memref<2x512xf32, #tpu.memory_space<vmem>>, vector<2x512xf32>,
    return
  }
}

</mosaic_0001>

<bundles_post_ra>
// kernel: denoise_net_forward.1
= control target key start
LH: loop header
LB: loop body
LE: loop exit
PB: predicated region body
PF: predicated region fallthrough
CT: control target
= control target key end

     0   :  { %13 = vsyncpa [#allocation4], 0  ;;  %s4351_s0 = inlined_call_operand.vmem [shape: s32[2], index: 0, kind: input, shape index: {}]   ;;  %s4352_s1 = inlined_call_operand.vmem [shape: f32[3,100], index: 1, kind: input, shape index: {}]   ;;  %s4353_s2 = inlined_call_operand.vmem [shape: f32[16,52], index: 2, kind: input, shape index: {}]   ;;  %s4354_s3 = inlined_call_operand.vmem [shape: f32[2,128], index: 3, kind: input, shape index: {}]   ;;  %s4355_s4 = inlined_call_operand.vmem [shape: f32[2,776], index: 4, kind: input, shape index: {}]   ;;  %s4356_s5 = inlined_call_operand.vmem [shape: f32[144,96], index: 5, kind: input, shape index: {}]   ;;  %s4357_s6 = inlined_call_operand.hbm [shape: f32[520,16], index: 6, kind: input, shape index: {}]   ;;  %s4358_s7 = inlined_call_operand.hbm [shape: f32[312,256], index: 7, kind: input, shape index: {}]   ;;  %s4359_s8 = inlined_call_operand.vmem [shape: f32[2,512], index: 8, kind: output, shape index: {}]  }
   0x1   :  { %14 = vsyncpa [#allocation6], 0 }
   0x2   :  { %15 = vsyncpa [#allocation3], 0  ;;  %s23_s29 = sshll.u32 %s4351_s0, 4  ;;  %s24_s29 = int_to_ptr.vmem [resolvable:$true] %s23_s29 }
   0x3   :  { %16 = vsyncpa [#allocation9], 0  ;;  %s33_s10 = sshll.u32 %s4352_s1, 4  ;;  %s3428_s11 = scalar_lea.vmem %s24_s29, 16  ;;  %s34_s10 = int_to_ptr.vmem [resolvable:$true] %s33_s10 }
   0x4   :  { %p3429_p0 = scmp.ne.s32.totalorder %s24_s29, %s3428_s11  ;;  %p3433_p1 = scmp.lt.s32.totalorder %s24_s29, %s24_s29 }
   0x5   :  { %p3434_p2 = scmp.lt.s32.totalorder %s3428_s11, %s3428_s11 }
   0x7   :  { %p3435_p3 = por %p3434_p2, %p3433_p1 }
   0x9   :  { %p3436_p4 = pnand %p3435_p3, %p3429_p0 }
   0xb   :  { %3439 = shalt.err (!%p3436_p4)
}
   0xc   :  { %s3500_s12 = smov [#allocation2]   ;;  %s3440_s13 = scalar_lea.vmem %s34_s10, 64 }
   0xd   :  { %26 = dma.vmem_to_smem %s24_s29, 16, %s3500_s12, [#allocation4]  }
   0xe   :  { %p3441_p5 = scmp.ne.s32.totalorder %s34_s10, %s3440_s13  ;;  %p3445_p6 = scmp.lt.s32.totalorder %s34_s10, %s34_s10 }
   0xf   :  { %p3446_p7 = scmp.lt.s32.totalorder %s3440_s13, %s3440_s13 }
  0x11   :  { %p3447_p8 = por %p3446_p7, %p3445_p6 }
  0x13   :  { %p3448_p9 = pnand %p3447_p8, %p3441_p5 }
  0x15   :  { %3451 = shalt.err (!%p3448_p9)
}
  0x16   :  { %s3501_s0 = smov [#allocation5]   ;;  %s3502_s1 = smov [#allocation7]  }
  0x17   :  { %36 = dma.vmem_to_smem %s34_s10, 64, %s3501_s0, [#allocation6]  }
  0x18   :  { %s50_s14 = sshll.u32 %s3502_s1, 4  ;;  %s51_s14 = int_to_ptr.vmem [resolvable:$true] %s50_s14 }
  0x19   :  { %s3460_s15 = scalar_lea.vmem %s51_s14, 8320  ;;  %p3465_p11 = scmp.lt.s32.totalorder %s51_s14, %s51_s14 }
  0x1a   :  { %p3461_p10 = scmp.ne.s32.totalorder %s51_s14, %s3460_s15  ;;  %p3466_p12 = scmp.lt.s32.totalorder %s3460_s15, %s3460_s15 }
  0x1c   :  { %p3467_p13 = por %p3466_p12, %p3465_p11 }
  0x1e   :  { %p3468_p0 = pnand %p3467_p13, %p3461_p10 }
  0x20   :  { %3471 = shalt.err (!%p3468_p0)
}
  0x21   :  { %s3503_s16 = smov 128   ;;  %s3504_s17 = smov 8  }
  0x22   :  { %56 = dma.hbm_to_vmem [thread:$0]  %s4357_s6, 8320, %s51_s14, [#allocation3], %s3503_s16, %s3503_s16, %s3504_s17  }
  0x23   :  { %s3505_s20 = smov [#allocation8]  }
  0x24   :  { %s62_s21 = sshll.u32 %s3505_s20, 4  ;;  %s63_s21 = int_to_ptr.vmem [resolvable:$true] %s62_s21 }
  0x25   :  { %s3480_s22 = scalar_lea.vmem %s63_s21, 9984  ;;  %p3485_p2 = scmp.lt.s32.totalorder %s63_s21, %s63_s21 }
  0x26   :  { %p3481_p1 = scmp.ne.s32.totalorder %s63_s21, %s3480_s22  ;;  %p3486_p3 = scmp.lt.s32.totalorder %s3480_s22, %s3480_s22 }
  0x28   :  { %p3487_p4 = por %p3486_p3, %p3485_p2 }
  0x2a   :  { %p3488_p5 = pnand %p3487_p4, %p3481_p1 }
  0x2c   :  { %3491 = shalt.err (!%p3488_p5)
}
  0x2d   :  { %s3506_s23 = smov 256   ;;  %s3507_s24 = smov 16  }
  0x2e   :  { %68 = dma.hbm_to_vmem [thread:$0]  %s4358_s7, 9984, %s63_s21, [#allocation9], %s3506_s23, %s3506_s23, %s3507_s24  }
  0x2f   :  { %3492 = dma.done.wait [#allocation4], 16  }
  0x30   :  { %3493 = vsyncadd [#allocation4], 4294967280 }
  0x31   :  { %3494 = dma.done.wait [#allocation6], 64  }
  0x32   :  { %3495 = vsyncadd [#allocation6], 4294967232 }
  0x33   :  { %3496 = dma.done.wait [#allocation3], 8320  }
  0x34   :  { %3497 = vsyncadd [#allocation3], 4294958976 }
  0x35   :  { %3498 = dma.done.wait [#allocation9], 9984  }
  0x36   :  { %3499 = vsyncadd [#allocation9], 4294957312 }
  0x37   :  { %81 = sfence }
  0x38   :  { %v131_v0 = vld [vmem:[%s4356_s5 + $0x30] sm:$0xf]  ;;  %vm143_vm0 = vcmask 1043456   ;;  %v130_v1 = vld [vmem:[%s4356_s5 + $0x28] sm:$0xff]  ;;  %vm136_vm1 = vcmask 424960   ;;  %v129_v2 = vld [vmem:[%s4356_s5 + $0x20] sm:$0xff] }
  0x39   :  { %2989 = vmatprep.subr.msk.mxu0 %vm143_vm0, %v131_v0  ;;  %v134_v3 = vld [vmem:[%s4353_s2] sm:$0xff]  ;;  %v3508_v4 = vmov 0.0   ;;  %v3595_v6 = vld [vmem:[%s4356_s5 + $0x78] sm:$0xff]  ;;  %v3605_v8 = vld [vmem:[%s4356_s5 + $0x70] sm:$0xff]  ;;  %vm3509_vm2 = vmmov 0   ;;  %s3510_s13 = smov 64  }
  0x3a   :  { %2990 = vmatpush3.msk.msra.mxu0 %vm143_vm0, %v131_v0  ;;  %3017 = vmatprep.subr.mxu1 %v3508_v4  ;;  %v3590_v5 = vld [vmem:[%s4356_s5 + $0x80] sm:$0xff]  ;;  %v128_v7 = vld [vmem:[%s4356_s5 + $0x18] sm:$0xff]  ;;  %v127_v9 = vld [vmem:[%s4356_s5 + $0x10] sm:$0xff]  ;;  %vm235_vm3 = vcmask 261120   ;;  %s3511_s19 = smov 96   ;;  %s3512_s20 = smov 32  }
  0x3b   :  { %2991 = vmatprep.subr.mxu0 %v130_v1  ;;  %3003 = vmatprep.mubr.msk.f32.mxu0 %vm136_vm1, %v134_v3  ;;  %v3615_v10 = vld [vmem:[%s4356_s5 + $0x68] sm:$0xff]  ;;  %v125_v12 = vld [vmem:[%s4356_s5] sm:$0xff]  ;;  %v224_v15 = vld [vmem:[%s4356_s5 + $0x58] sm:$0xff]  ;;  %vm562_vm4 = vcmask 523264   ;;  %s4216_s26 = sld [smem:[#allocation2 + $0x1]]  ;;  %s3514_s14 = smov 120  }
  0x3c   :  { %2992 = vmatpush3.msra.mxu0 %v130_v1  ;;  %3018 = vmatpush3.msra.mxu1 %v3590_v5  ;;  %v126_v11 = vld [vmem:[%s4356_s5 + $0x8] sm:$0xff]  ;;  %v225_v14 = vld [vmem:[%s4356_s5 + $0x60] sm:$0xff]  ;;  %v223_v16 = vld [vmem:[%s4356_s5 + $0x50] sm:$0xff]  ;;  %vm2150_vm6 = vcmask 64512   ;;  %vm2272_vm7 = vcmask 58368   ;;  %vm2658_vm10 = vcmask 1041408  }
  0x3d   :  { %2993 = vmatprep.subr.mxu0 %v129_v2  ;;  %3019 = vmatprep.subr.mxu1 %v3508_v4  ;;  %v135_v13 = vld [vmem:[%s4353_s2 + $0x8] sm:$0xff]  ;;  %v132_v24 = vld [vmem:[%s4356_s5 + $0x38] sm:$0xff]  ;;  %v133_v25 = vld [vmem:[%s4356_s5 + $0x40] sm:$0xff]  ;;  %vm2664_vm11 = vcmask 72704   ;;  %vm2666_vm12 = vcmask 80896  }
  0x3e   :  { %2994 = vmatpush3.msra.mxu0 %v129_v2  ;;  %3020 = vmatpush3.msra.mxu1 %v3595_v6  ;;  %v222_v17 = vld [vmem:[%s4356_s5 + $0x48] sm:$0xff]  ;;  %v441_v50 = vld [vmem:[#allocation7 + $0x38] sm:$0xff]  ;;  %v440_v51 = vld [vmem:[#allocation7 + $0x30] sm:$0xff] }
  0x3f   :  { %2995 = vmatprep.subr.mxu0 %v128_v7  ;;  %3021 = vmatprep.subr.mxu1 %v3508_v4  ;;  %v2710_v18 = vld [vmem:[%s4356_s5 + $0x89] ss:$0 sm:$0xff]  ;;  %v2707_v29 = vld [vmem:[%s4356_s5 + $0x88] ss:$0 sm:$0xff]  ;;  %v438_v56 = vld [vmem:[#allocation7 + $0x20] sm:$0xff] }
  0x40   :  { %2996 = vmatpush3.msra.mxu0 %v128_v7  ;;  %3022 = vmatpush3.msra.mxu1 %v3605_v8  ;;  %v439_v53 = vld [vmem:[#allocation7 + $0x28] sm:$0xff]  ;;  %v437_v58 = vld [vmem:[#allocation7 + $0x18] sm:$0xff]  ;;  %v436_v0 = vld [vmem:[#allocation7 + $0x10] sm:$0xff] }
  0x41   :  { %2997 = vmatprep.subr.mxu0 %v127_v9  ;;  %3023 = vmatprep.subr.mxu1 %v3508_v4  ;;  %v435_v1 = vld [vmem:[#allocation7 + $0x8] sm:$0xff]  ;;  %v434_v2 = vld [vmem:[#allocation7] sm:$0xff]  ;;  %s103_s27 = sshra.s32 %s4216_s26, 7  ;;  %s108_s9 = sand.u32 127, %s4216_s26 }
  0x42   :  { %2998 = vmatpush3.msra.mxu0 %v127_v9  ;;  %3024 = vmatpush3.msra.mxu1 %v3615_v10  ;;  %s4222_s29 = sshll.u32 %s103_s27, 7  ;;  %s90_s11 = sld [smem:[#allocation5 + %s4216_s26]] }
  0x43   :  { %2999 = vmatprep.subr.mxu0 %v126_v11  ;;  %3025 = vmatprep.mubr.msk.f32.mxu1 %vm3509_vm2, %v3508_v4  ;;  %s2747_s30 = sadd.s32 128, %s4222_s29 }
  0x44   :  { %3000 = vmatpush3.msra.mxu0 %v126_v11  ;;  %3026 = vmatmul.mubr.f32.vlgmr.msra.gmra.mxu1 %v3508_v4 }
  0x45   :  { %3001 = vmatprep.subr.mxu0 %v125_v12  ;;  %3039 = vmatprep.subr.mxu1 %v3508_v4 }
  0x46   :  { %3002 = vmatpush3.msra.mxu0 %v125_v12  ;;  %3055 = vmatprep.mubr.msk.f32.mxu1 %vm3509_vm2, %v3508_v4 }
  0x47   :  { %3004 = vmatmul.mubr.msk.f32.vlgmr.msra.gmra.mxu0 %vm136_vm1, %v135_v13  ;;  %3006 = vmatprep.subr.mxu0 %v225_v14 }
  0x48   :  { %3007 = vmatpush3.msra.mxu0 %v225_v14  ;;  %403 = vrot.lane.b32.xlu0 %v2710_v18, %s3510_s13  ;;  %v3728_v18 = vld [vmem:[#allocation7 + $0x68] sm:$0xff] }
  0x49   :  { %3008 = vmatprep.subr.mxu0 %v224_v15 }
  0x4a   :  { %3009 = vmatpush3.msra.mxu0 %v224_v15 }
  0x4b   :  { %3010 = vmatprep.subr.mxu0 %v223_v16 }
  0x4c   :  { %3011 = vmatpush3.msra.mxu0 %v223_v16  ;;  %v3722_v16 = vld [vmem:[#allocation7 + $0x78] sm:$0xff] }
  0x4d   :  { %3012 = vmatprep.subr.mxu0 %v222_v17  ;;  %3040 = vmatpush3.msra.mxu1 %v3722_v16 }
  0x4e   :  { %3013 = vmatpush3.msra.mxu0 %v222_v17  ;;  %v3724_v17 = vld [vmem:[#allocation7 + $0x70] sm:$0xff]  ;;  %3041 = vmatprep.subr.mxu1 %v3508_v4 }
  0x4f   :  { %3028 = vmatprep.subr.mxu0 %v3508_v4  ;;  %3042 = vmatpush3.msra.mxu1 %v3724_v17 }
  0x50   :  { %3043 = vmatprep.subr.mxu1 %v3508_v4 }
  0x51   :  { %3044 = vmatpush3.msra.mxu1 %v3728_v18 }
  0x52   :  { %3045 = vmatprep.subr.mxu1 %v3508_v4 }
  0xba   :  { %v3653_v19 = vpop.permute.xlu0 %403 }
 0x104   :  { %v391_v20 = vpop.f32.mrf.mxu1 }
 0x105   :  { %v406_v21 = vadd.f32 %v3653_v19, %v391_v20 }
 0x106   :  { %v3027_v22 = vpop.f32.mrf.mxu1 }
 0x107   :  { %v3005_v23 = vpop.f32.mrf.mxu0  ;;  %408 = vrot.lane.b32.xlu0 %v406_v21, %s3510_s13  ;;  %v3736_v21 = vld [vmem:[#allocation7 + $0x58] sm:$0xff]  ;;  %v3740_v22 = vld [vmem:[#allocation7 + $0x50] sm:$0xff] }
 0x108   :  { %v3665_v28 = vadd.f32 %v3005_v23, %v133_v25  ;;  %v3744_v23 = vld [vmem:[#allocation7 + $0x48] sm:$0xff] }
 0x109   :  { %v213_v26 = vpop.f32.mrf.mxu0 }
 0x10a   :  { %v3663_v27 = vadd.f32 %v213_v26, %v132_v24  ;;  %v3750_v24 = vld [vmem:[#allocation7 + $0x40] sm:$0xff] }
 0x10c   :  { %3014 = vmatprep.mubr.msk.f32.mxu0 %vm235_vm3, %v3663_v27 }
 0x10d   :  { %3015 = vmatmul.mubr.msk.f32.vlgmr.msra.gmra.mxu0 %vm235_vm3, %v3665_v28 }
 0x10e   :  { %3029 = vmatpush3.msra.mxu0 %v3590_v5  ;;  %3036 = vmatprep.mubr.msk.f32.mxu0 %vm3509_vm2, %v3508_v4 }
 0x10f   :  { %3030 = vmatprep.subr.mxu0 %v3508_v4 }
 0x110   :  { %3031 = vmatpush3.msra.mxu0 %v3595_v6 }
 0x111   :  { %3032 = vmatprep.subr.mxu0 %v3508_v4 }
 0x112   :  { %3033 = vmatpush3.msra.mxu0 %v3605_v8 }
 0x113   :  { %3034 = vmatprep.subr.mxu0 %v3508_v4 }
 0x114   :  { %3035 = vmatpush3.msra.mxu0 %v3615_v10 }
 0x115   :  { %3058 = vmatprep.subr.mxu0 %v3508_v4 }
 0x179   :  { %v409_v38 = vpop.permute.xlu0 %408 }
 0x1cd   :  { %v3016_v30 = vpop.f32.mrf.mxu0 }
 0x1ce   :  { %v3684_v31 = vadd.f32 %v3016_v30, %v2707_v29 }
 0x1cf   :  { %v308_v32 = vpop.f32.mrf.mxu0 }
 0x1d0   :  { %v3686_v33 = vadd.f32 %v2707_v29, %v308_v32 }
 0x1d2   :  { %v395_v34 = vadd.f32 %v391_v20, %v3686_v33  ;;  %v3732_v20 = vld [vmem:[#allocation7 + $0x60] sm:$0xff] }
 0x1d3   :  { %3046 = vmatpush3.msra.mxu1 %v3732_v20 }
 0x1d4   :  { %v2711_v35 = vmul.f32 -1.442695, %v395_v34  ;;  %3047 = vmatprep.subr.mxu1 %v3508_v4 }
 0x1d5   :  { %3048 = vmatpush3.msra.mxu1 %v3736_v21 }
 0x1d6   :  { %3357 = vpow2.f32 %v2711_v35  ;;  %3049 = vmatprep.subr.mxu1 %v3508_v4 }
 0x1d7   :  { %3050 = vmatpush3.msra.mxu1 %v3740_v22 }
 0x1d8   :  { %3051 = vmatprep.subr.mxu1 %v3508_v4 }
 0x1d9   :  { %3052 = vmatpush3.msra.mxu1 %v3744_v23 }
 0x1da   :  { %3053 = vmatprep.subr.mxu1 %v3508_v4 }
 0x1db   :  { %3054 = vmatpush3.msra.mxu1 %v3750_v24 }
 0x1dc   :  { %3077 = vmatprep.subr.mxu1 %v3508_v4 }
 0x1e3   :  { %v3358_v36 = vpop.eup %3357 }
 0x1e4   :  { %v399_v37 = vadd.f32 1.0, %v3358_v36 }
 0x1e6   :  { %3359 = vrcp.f32 %v399_v37 }
 0x1f3   :  { %v3360_v39 = vpop.eup %3359 }
 0x1f4   :  { %v411_v40 = vmul.f32 %v3360_v39, %v409_v38  ;;  %v418_v44 = vsub.f32 1.0, %v3360_v39  ;;  %v424_v46 = vmul.f32 0.0, %v3360_v39 }
 0x1f6   :  { %413 = vrot.lane.b32.xlu1 %v411_v40, %s3510_s13 }
 0x268   :  { %v414_v41 = vpop.permute.xlu1 %413 }
 0x269   :  { %v416_v42 = vadd.f32 %v414_v41, %v3686_v33 }
 0x26b   :  { %3361 = vtanh.f32 %v416_v42 }
 0x278   :  { %v3362_v43 = vpop.eup %3361 }
 0x279   :  { %420 = vrot.lane.b32.xlu1 %v3362_v43, %s3511_s19 }
 0x2eb   :  { %v421_v45 = vpop.permute.xlu1 %420 }
 0x2ec   :  { %v423_v47 = vmul.f32 %v421_v45, %v418_v44 }
 0x2ee   :  { %v3692_v48 = vadd.f32 %v424_v46, %v423_v47 }
 0x2f0   :  { %427 = vrot.lane.b32.xlu0 %v3692_v48, %s3511_s19  ;;  %v543_v25 = vrot.slane %v3692_v48, 6 }
 0x362   :  { %v428_v49 = vpop.permute.xlu0 %427 }
 0x363   :  { %3037 = vmatmul.mubr.msk.f32.vlgmr.msra.gmra.mxu0 %vm235_vm3, %v428_v49 }
 0x364   :  { %3074 = vmatprep.mubr.msk.f32.mxu0 %vm3509_vm2, %v3508_v4  ;;  %3059 = vmatpush3.msra.mxu0 %v441_v50 }
 0x365   :  { %3060 = vmatprep.subr.mxu0 %v3508_v4 }
 0x366   :  { %3061 = vmatpush3.msra.mxu0 %v440_v51 }
 0x367   :  { %3062 = vmatprep.subr.mxu0 %v3508_v4 }
 0x368   :  { %3063 = vmatpush3.msra.mxu0 %v439_v53 }
 0x369   :  { %3064 = vmatprep.subr.mxu0 %v3508_v4 }
 0x36a   :  { %3065 = vmatpush3.msra.mxu0 %v438_v56 }
 0x36b   :  { %3066 = vmatprep.subr.mxu0 %v3508_v4 }
 0x36c   :  { %3067 = vmatpush3.msra.mxu0 %v437_v58 }
 0x36d   :  { %3068 = vmatprep.subr.mxu0 %v3508_v4 }
 0x36e   :  { %3069 = vmatpush3.msra.mxu0 %v436_v0 }
 0x36f   :  { %3070 = vmatprep.subr.mxu0 %v3508_v4 }
 0x370   :  { %3071 = vmatpush3.msra.mxu0 %v435_v1 }
 0x371   :  { %3072 = vmatprep.subr.mxu0 %v3508_v4 }
 0x372   :  { %3073 = vmatpush3.msra.mxu0 %v434_v2  ;;  %v3798_v2 = vld [vmem:[#allocation7 + $0xb8] sm:$0xff] }
 0x373   :  { %3088 = vmatprep.subr.mxu0 %v3508_v4 }
 0x423   :  { %v510_v52 = vpop.f32.mrf.mxu0 }
 0x424   :  { %v524_v54 = vadd.f32 %v510_v52, %v3653_v19  ;;  %v515_v59 = vrot.slane %v510_v52, 6 }
 0x425   :  { %v3038_v55 = vpop.f32.mrf.mxu0 }
 0x426   :  { %v526_v57 = vrot.slane %v524_v54, 6  ;;  %v517_v60 = vadd.f32 %v515_v59, %v3686_v33 }
 0x428   :  { %527 = vrot.lane.b32.xlu1 %v526_v57, %s3510_s13  ;;  %v2713_v61 = vmul.f32 -1.442695, %v517_v60 }
 0x42a   :  { %3363 = vpow2.f32 %v2713_v61 }
 0x437   :  { %v3364_v62 = vpop.eup %3363 }
 0x438   :  { %v521_v63 = vadd.f32 1.0, %v3364_v62 }
 0x43a   :  { %3365 = vrcp.f32 %v521_v63 }
 0x447   :  { %v3366_v3 = vpop.eup %3365 }
 0x448   :  { %v537_v26 = vsub.f32 1.0, %v3366_v3  ;;  %v545_v30 = vmul.f32 %v3366_v3, %v543_v25 }
 0x49a   :  { %v528_v7 = vpop.permute.xlu1 %527 }
 0x49b   :  { %v530_v9 = vmul.f32 %v3366_v3, %v528_v7  ;;  %v3800_v3 = vld [vmem:[#allocation7 + $0xb0] sm:$0xff] }
 0x49d   :  { %532 = vrot.lane.b32.xlu0 %v530_v9, %s3510_s13  ;;  %v3804_v9 = vld [vmem:[#allocation7 + $0xa8] sm:$0xff] }
 0x4a1   :  { %430 = vrot.lane.b32.xlu0 %v3663_v27, %s3512_s20 }
 0x50f   :  { %v533_v11 = vpop.permute.xlu0 %532 }
 0x510   :  { %v535_v12 = vadd.f32 %v533_v11, %v3686_v33 }
 0x512   :  { %3367 = vtanh.f32 %v535_v12 }
 0x513   :  { %v3714_v13 = vpop.permute.xlu0 %430 }
 0x514   :  { %v433_v14 = vsel %vm235_vm3, %v428_v49, %v3714_v13 }
 0x515   :  { %3075 = vmatmul.mubr.msk.f32.vlgmr.msra.gmra.mxu0 %vm562_vm4, %v433_v14  ;;  %v3809_v14 = vld [vmem:[#allocation7 + $0xa0] sm:$0xff] }
 0x516   :  { %3104 = vmatprep.mubr.msk.f32.mxu0 %vm3509_vm2, %v3508_v4  ;;  %3089 = vmatpush3.msra.mxu0 %v3798_v2 }
 0x517   :  { %3090 = vmatprep.subr.mxu0 %v3508_v4 }
 0x518   :  { %3091 = vmatpush3.msra.mxu0 %v3800_v3 }
 0x519   :  { %3092 = vmatprep.subr.mxu0 %v3508_v4 }
 0x51a   :  { %3093 = vmatpush3.msra.mxu0 %v3804_v9 }
 0x51b   :  { %3094 = vmatprep.subr.mxu0 %v3508_v4 }
 0x51c   :  { %3095 = vmatpush3.msra.mxu0 %v3809_v14 }
 0x51d   :  { %3096 = vmatprep.subr.mxu0 %v3508_v4 }
 0x51f   :  { %v3368_v15 = vpop.eup %3367 }
 0x520   :  { %539 = vrot.lane.b32.xlu1 %v3368_v15, %s3511_s19 }
 0x592   :  { %v540_v27 = vpop.permute.xlu1 %539 }
 0x593   :  { %v542_v29 = vmul.f32 %v540_v27, %v537_v26 }
 0x595   :  { %v546_v32 = vadd.f32 %v545_v30, %v542_v29 }
 0x597   :  { %548 = vrot.lane.b32.xlu1 %v546_v32, %s3511_s19  ;;  %v708_v34 = vrot.slane %v546_v32, 2  ;;  %v812_v59 = vrot.slane %v546_v32, 6  ;;  %v3817_v32 = vld [vmem:[#allocation7 + $0x98] sm:$0xff] }
 0x598   :  { %3097 = vmatpush3.msra.mxu0 %v3817_v32 }
 0x599   :  { %709 = vrot.lane.b32.xlu0 %v708_v34, %s3511_s19  ;;  %3098 = vmatprep.subr.mxu0 %v3508_v4  ;;  %v3821_v34 = vld [vmem:[#allocation7 + $0x90] sm:$0xff] }
 0x59a   :  { %3099 = vmatpush3.msra.mxu0 %v3821_v34 }
 0x59b   :  { %3100 = vmatprep.subr.mxu0 %v3508_v4 }
 0x5d5   :  { %v3757_v35 = vpop.f32.mrf.mxu0 }
 0x5d7   :  { %v3076_v36 = vpop.f32.mrf.mxu0 }
 0x5d8   :  { %v3825_v36 = vld [vmem:[#allocation7 + $0x88] sm:$0xff] }
 0x5d9   :  { %3101 = vmatpush3.msra.mxu0 %v3825_v36 }
 0x5da   :  { %3102 = vmatprep.subr.mxu0 %v3508_v4 }
 0x609   :  { %v549_v37 = vpop.permute.xlu1 %548 }
 0x60a   :  { %v551_v38 = vsel %vm235_vm3, %v549_v37, %v3714_v13  ;;  %v3829_v37 = vld [vmem:[#allocation7 + $0x80] sm:$0xff] }
 0x60b   :  { %v561_v39 = vrot.slane %v551_v38, 2  ;;  %v710_v40 = vpop.permute.xlu0 %709  ;;  %3103 = vmatpush3.msra.mxu0 %v3829_v37 }
 0x60c   :  { %3137 = vmatprep.subr.mxu0 %v3508_v4 }
 0x60d   :  { %3056 = vmatmul.mubr.msk.f32.vlgmr.msra.gmra.mxu1 %vm562_vm4, %v561_v39 }
 0x60e   :  { %3078 = vmatpush3.msra.mxu1 %v3590_v5  ;;  %3085 = vmatprep.mubr.msk.f32.mxu1 %vm3509_vm2, %v3508_v4 }
 0x60f   :  { %3079 = vmatprep.subr.mxu1 %v3508_v4 }
 0x610   :  { %3080 = vmatpush3.msra.mxu1 %v3595_v6 }
 0x611   :  { %3081 = vmatprep.subr.mxu1 %v3508_v4 }
 0x612   :  { %3082 = vmatpush3.msra.mxu1 %v3605_v8 }
 0x613   :  { %3083 = vmatprep.subr.mxu1 %v3508_v4 }
 0x614   :  { %3084 = vmatpush3.msra.mxu1 %v3615_v10 }
 0x615   :  { %3086 = vmatmul.mubr.msk.f32.vlgmr.msra.gmra.mxu1 %vm235_vm3, %v710_v40  ;;  %3107 = vmatprep.subr.mxu1 %v3508_v4 }
 0x616   :  { %3108 = vmatpush3.msra.mxu1 %v3590_v5  ;;  %3115 = vmatprep.mubr.msk.f32.mxu1 %vm3509_vm2, %v3508_v4 }
 0x617   :  { %3109 = vmatprep.subr.mxu1 %v3508_v4 }
 0x618   :  { %3110 = vmatpush3.msra.mxu1 %v3595_v6 }
 0x619   :  { %3111 = vmatprep.subr.mxu1 %v3508_v4 }
 0x61a   :  { %3112 = vmatpush3.msra.mxu1 %v3605_v8 }
 0x61b   :  { %3113 = vmatprep.subr.mxu1 %v3508_v4 }
 0x61c   :  { %3114 = vmatpush3.msra.mxu1 %v3615_v10 }
 0x61d   :  { %3118 = vmatprep.subr.mxu1 %v3508_v4 }
 0x6cd   :  { %v3783_v41 = vpop.f32.mrf.mxu1 }
 0x6cf   :  { %v3057_v42 = vpop.f32.mrf.mxu1 }
 0x6d5   :  { %v779_v43 = vpop.f32.mrf.mxu1 }
 0x6d6   :  { %v793_v44 = vadd.f32 %v779_v43, %v3653_v19  ;;  %v784_v47 = vrot.slane %v779_v43, 4 }
 0x6d7   :  { %v3087_v45 = vpop.f32.mrf.mxu1 }
 0x6d8   :  { %v795_v46 = vrot.slane %v793_v44, 4  ;;  %v786_v48 = vadd.f32 %v784_v47, %v3686_v33 }
 0x6da   :  { %796 = vrot.lane.b32.xlu1 %v795_v46, %s3510_s13  ;;  %v2717_v49 = vmul.f32 -1.442695, %v786_v48 }
 0x6dc   :  { %3369 = vpow2.f32 %v2717_v49 }
 0x6e9   :  { %v3370_v50 = vpop.eup %3369 }
 0x6ea   :  { %v790_v51 = vadd.f32 1.0, %v3370_v50 }
 0x6ec   :  { %3371 = vrcp.f32 %v790_v51 }
 0x6f9   :  { %v3372_v52 = vpop.eup %3371 }
 0x6fa   :  { %v806_v58 = vsub.f32 1.0, %v3372_v52  ;;  %v814_v61 = vmul.f32 %v3372_v52, %v812_v59  ;;  %v3865_v59 = vld [vmem:[#allocation7 + $0xf8] sm:$0xff] }
 0x74c   :  { %v797_v53 = vpop.permute.xlu1 %796 }
 0x74d   :  { %v799_v54 = vmul.f32 %v3372_v52, %v797_v53 }
 0x74f   :  { %801 = vrot.lane.b32.xlu0 %v799_v54, %s3510_s13  ;;  %v705_v54 = vadd.f32 %v3757_v35, %v3783_v41  ;;  %v3875_v41 = vld [vmem:[#allocation7 + $0xe0] sm:$0xff] }
 0x7c1   :  { %v802_v55 = vpop.permute.xlu0 %801 }
 0x7c2   :  { %v804_v56 = vadd.f32 %v802_v55, %v3686_v33 }
 0x7c4   :  { %3373 = vtanh.f32 %v804_v56 }
 0x7d1   :  { %v3374_v57 = vpop.eup %3373 }
 0x7d2   :  { %808 = vrot.lane.b32.xlu1 %v3374_v57, %s3511_s19 }
 0x844   :  { %v809_v60 = vpop.permute.xlu1 %808 }
 0x845   :  { %v811_v62 = vmul.f32 %v809_v60, %v806_v58  ;;  %v3867_v60 = vld [vmem:[#allocation7 + $0xf0] sm:$0xff] }
 0x847   :  { %v3791_v63 = vadd.f32 %v814_v61, %v811_v62  ;;  %v3871_v61 = vld [vmem:[#allocation7 + $0xe8] sm:$0xff] }
 0x849   :  { %v904_v0 = vrot.slane %v3791_v63, 4  ;;  %v1008_v48 = vrot.slane %v3791_v63, 6 }
 0x84b   :  { %905 = vrot.lane.b32.xlu0 %v904_v0, %s3511_s19 }
 0x8bd   :  { %v906_v1 = vpop.permute.xlu0 %905 }
 0x8be   :  { %3116 = vmatmul.mubr.msk.f32.vlgmr.msra.gmra.mxu1 %vm235_vm3, %v906_v1 }
 0x8bf   :  { %3134 = vmatprep.mubr.msk.f32.mxu1 %vm3509_vm2, %v3508_v4  ;;  %3119 = vmatpush3.msra.mxu1 %v3865_v59 }
 0x8c0   :  { %3120 = vmatprep.subr.mxu1 %v3508_v4 }
 0x8c1   :  { %3121 = vmatpush3.msra.mxu1 %v3867_v60 }
 0x8c2   :  { %3122 = vmatprep.subr.mxu1 %v3508_v4 }
 0x8c3   :  { %3123 = vmatpush3.msra.mxu1 %v3871_v61 }
 0x8c4   :  { %3124 = vmatprep.subr.mxu1 %v3508_v4 }
 0x8c5   :  { %3125 = vmatpush3.msra.mxu1 %v3875_v41 }
 0x8c6   :  { %3126 = vmatprep.subr.mxu1 %v3508_v4 }
 0x97e   :  { %v975_v7 = vpop.f32.mrf.mxu1 }
 0x97f   :  { %v989_v11 = vadd.f32 %v975_v7, %v3653_v19  ;;  %v980_v25 = vrot.slane %v975_v7, 2 }
 0x980   :  { %v3117_v12 = vpop.f32.mrf.mxu1 }
 0x981   :  { %v991_v15 = vrot.slane %v989_v11, 2  ;;  %v982_v26 = vadd.f32 %v980_v25, %v3686_v33  ;;  %v3884_v12 = vld [vmem:[#allocation7 + $0xd8] sm:$0xff]  ;;  %v3892_v25 = vld [vmem:[#allocation7 + $0xc8] sm:$0xff] }
 0x982   :  { %3127 = vmatpush3.msra.mxu1 %v3884_v12 }
 0x983   :  { %992 = vrot.lane.b32.xlu1 %v991_v15, %s3510_s13  ;;  %v2720_v27 = vmul.f32 -1.442695, %v982_v26  ;;  %3128 = vmatprep.subr.mxu1 %v3508_v4  ;;  %v3888_v15 = vld [vmem:[#allocation7 + $0xd0] sm:$0xff]  ;;  %v3896_v26 = vld [vmem:[#allocation7 + $0xc0] sm:$0xff] }
 0x984   :  { %3129 = vmatpush3.msra.mxu1 %v3888_v15 }
 0x985   :  { %3375 = vpow2.f32 %v2720_v27  ;;  %3130 = vmatprep.subr.mxu1 %v3508_v4 }
 0x986   :  { %3131 = vmatpush3.msra.mxu1 %v3892_v25 }
 0x987   :  { %3132 = vmatprep.subr.mxu1 %v3508_v4 }
 0x988   :  { %3133 = vmatpush3.msra.mxu1 %v3896_v26 }
 0x989   :  { %3167 = vmatprep.subr.mxu1 %v3508_v4 }
 0x992   :  { %v3376_v29 = vpop.eup %3375 }
 0x993   :  { %v986_v30 = vadd.f32 1.0, %v3376_v29 }
 0x995   :  { %3377 = vrcp.f32 %v986_v30 }
 0x9a2   :  { %v3378_v38 = vpop.eup %3377 }
 0x9a3   :  { %v1002_v47 = vsub.f32 1.0, %v3378_v38  ;;  %v1010_v50 = vmul.f32 %v3378_v38, %v1008_v48 }
 0x9f5   :  { %v993_v39 = vpop.permute.xlu1 %992 }
 0x9f6   :  { %v995_v40 = vmul.f32 %v3378_v38, %v993_v39 }
 0x9f8   :  { %997 = vrot.lane.b32.xlu0 %v995_v40, %s3510_s13 }
 0x9fc   :  { %817 = vrot.lane.b32.xlu0 %v3791_v63, %s3511_s19 }
 0xa6a   :  { %v998_v42 = vpop.permute.xlu0 %997 }
 0xa6b   :  { %v1000_v43 = vadd.f32 %v998_v42, %v3686_v33 }
 0xa6d   :  { %3379 = vtanh.f32 %v1000_v43 }
 0xa6e   :  { %v818_v44 = vpop.permute.xlu0 %817 }
 0xa6f   :  { %v820_v45 = vsel %vm235_vm3, %v818_v44, %v3714_v13 }
 0xa70   :  { %v830_v46 = vrot.slane %v820_v45, 4 }
 0xa72   :  { %3105 = vmatmul.mubr.msk.f32.vlgmr.msra.gmra.mxu0 %vm562_vm4, %v830_v46 }
 0xa73   :  { %3138 = vmatpush3.msra.mxu0 %v3590_v5  ;;  %3145 = vmatprep.mubr.msk.f32.mxu0 %vm3509_vm2, %v3508_v4 }
 0xa74   :  { %3139 = vmatprep.subr.mxu0 %v3508_v4 }
 0xa75   :  { %3140 = vmatpush3.msra.mxu0 %v3595_v6 }
 0xa76   :  { %3141 = vmatprep.subr.mxu0 %v3508_v4 }
 0xa77   :  { %3142 = vmatpush3.msra.mxu0 %v3605_v8 }
 0xa78   :  { %3143 = vmatprep.subr.mxu0 %v3508_v4 }
 0xa79   :  { %3144 = vmatpush3.msra.mxu0 %v3615_v10 }
 0xa7a   :  { %v3380_v33 = vpop.eup %3379  ;;  %3148 = vmatprep.subr.mxu0 %v3508_v4 }
 0xa7b   :  { %1004 = vrot.lane.b32.xlu1 %v3380_v33, %s3511_s19 }
 0xaed   :  { %v1005_v49 = vpop.permute.xlu1 %1004 }
 0xaee   :  { %v1007_v51 = vmul.f32 %v1005_v49, %v1002_v47 }
 0xaf0   :  { %v3852_v52 = vadd.f32 %v1010_v50, %v1007_v51 }
 0xaf2   :  { %v1100_v53 = vrot.slane %v3852_v52, 6 }
 0xaf4   :  { %1101 = vrot.lane.b32.xlu1 %v1100_v53, %s3511_s19 }
 0xb32   :  { %v899_v55 = vpop.f32.mrf.mxu0 }
 0xb33   :  { %v3860_v56 = vadd.f32 %v899_v55, %v705_v54  ;;  %v3930_v54 = vld [vmem:[#allocation7 + $0x138] sm:$0xff]  ;;  %v3936_v55 = vld [vmem:[#allocation7 + $0x128] sm:$0xff] }
 0xb34   :  { %v3106_v57 = vpop.f32.mrf.mxu0 }
 0xb66   :  { %v1102_v58 = vpop.permute.xlu1 %1101 }
 0xb67   :  { %3146 = vmatmul.mubr.msk.f32.vlgmr.msra.gmra.mxu0 %vm235_vm3, %v1102_v58  ;;  %v3941_v58 = vld [vmem:[#allocation7 + $0x120] sm:$0xff] }
 0xb68   :  { %3164 = vmatprep.mubr.msk.f32.mxu0 %vm3509_vm2, %v3508_v4  ;;  %3149 = vmatpush3.msra.mxu0 %v3930_v54 }
 0xb69   :  { %3150 = vmatprep.subr.mxu0 %v3508_v4 }
 0xc27   :  { %v1171_v35 = vpop.f32.mrf.mxu0 }
 0xc28   :  { %v1182_v62 = vadd.f32 %v1171_v35, %v3653_v19  ;;  %v1175_v0 = vadd.f32 %v1171_v35, %v3684_v31 }
 0xc29   :  { %v3147_v63 = vpop.f32.mrf.mxu0 }
 0xc2a   :  { %1184 = vrot.lane.b32.xlu0 %v1182_v62, %s3510_s13  ;;  %v2723_v1 = vmul.f32 -1.442695, %v1175_v0  ;;  %v3945_v62 = vld [vmem:[#allocation7 + $0x118] sm:$0xff] }
 0xc2c   :  { %3381 = vpow2.f32 %v2723_v1 }
 0xc39   :  { %v3382_v7 = vpop.eup %3381 }
 0xc3a   :  { %v1179_v11 = vadd.f32 1.0, %v3382_v7 }
 0xc3c   :  { %3383 = vrcp.f32 %v1179_v11 }
 0xc49   :  { %v3384_v27 = vpop.eup %3383 }
 0xc4a   :  { %v1194_v44 = vsub.f32 1.0, %v3384_v27  ;;  %v1201_v46 = vmul.f32 %v3384_v27, %v1100_v53 }
 0xc9c   :  { %v1185_v29 = vpop.permute.xlu0 %1184 }
 0xc9d   :  { %v1187_v30 = vmul.f32 %v3384_v27, %v1185_v29  ;;  %v3953_v27 = vld [vmem:[#allocation7 + $0x110] sm:$0xff]  ;;  %v3957_v29 = vld [vmem:[#allocation7 + $0x108] sm:$0xff] }
 0xc9f   :  { %1189 = vrot.lane.b32.xlu1 %v1187_v30, %s3510_s13  ;;  %v3961_v30 = vld [vmem:[#allocation7 + $0x100] sm:$0xff] }
 0xca3   :  { %1013 = vrot.lane.b32.xlu1 %v3852_v52, %s3511_s19  ;;  %v3932_v52 = vld [vmem:[#allocation7 + $0x130] sm:$0xff] }
 0xca4   :  { %3151 = vmatpush3.msra.mxu0 %v3932_v52 }
 0xca5   :  { %3152 = vmatprep.subr.mxu0 %v3508_v4 }
 0xca6   :  { %3153 = vmatpush3.msra.mxu0 %v3936_v55 }
 0xca7   :  { %3154 = vmatprep.subr.mxu0 %v3508_v4 }
 0xca8   :  { %3155 = vmatpush3.msra.mxu0 %v3941_v58 }
 0xca9   :  { %3156 = vmatprep.subr.mxu0 %v3508_v4 }
 0xcaa   :  { %3157 = vmatpush3.msra.mxu0 %v3945_v62 }
 0xcab   :  { %3158 = vmatprep.subr.mxu0 %v3508_v4 }
 0xcac   :  { %3159 = vmatpush3.msra.mxu0 %v3953_v27 }
 0xcad   :  { %3160 = vmatprep.subr.mxu0 %v3508_v4 }
 0xcae   :  { %3161 = vmatpush3.msra.mxu0 %v3957_v29 }
 0xcaf   :  { %3162 = vmatprep.subr.mxu0 %v3508_v4 }
 0xcb0   :  { %3163 = vmatpush3.msra.mxu0 %v3961_v30 }
 0xcb1   :  { %3197 = vmatprep.subr.mxu0 %v3508_v4 }
 0xd11   :  { %v1190_v38 = vpop.permute.xlu1 %1189 }
 0xd12   :  { %v1192_v39 = vadd.f32 %v1190_v38, %v3684_v31 }
 0xd14   :  { %3385 = vtanh.f32 %v1192_v39 }
 0xd15   :  { %v1014_v40 = vpop.permute.xlu1 %1013 }
 0xd16   :  { %v1016_v42 = vsel %vm235_vm3, %v1014_v40, %v3714_v13 }
 0xd17   :  { %v1026_v43 = vrot.slane %v1016_v42, 6 }
 0xd19   :  { %3135 = vmatmul.mubr.msk.f32.vlgmr.msra.gmra.mxu1 %vm562_vm4, %v1026_v43 }
 0xd1a   :  { %3168 = vmatpush3.msra.mxu1 %v3590_v5  ;;  %3175 = vmatprep.mubr.msk.f32.mxu1 %vm3509_vm2, %v3508_v4 }
 0xd1b   :  { %3169 = vmatprep.subr.mxu1 %v3508_v4 }
 0xd1c   :  { %3170 = vmatpush3.msra.mxu1 %v3595_v6 }
 0xd1d   :  { %3171 = vmatprep.subr.mxu1 %v3508_v4 }
 0xd1e   :  { %3172 = vmatpush3.msra.mxu1 %v3605_v8 }
 0xd1f   :  { %3173 = vmatprep.subr.mxu1 %v3508_v4 }
 0xd20   :  { %3174 = vmatpush3.msra.mxu1 %v3615_v10 }
 0xd21   :  { %v3386_v13 = vpop.eup %3385  ;;  %3178 = vmatprep.subr.mxu1 %v3508_v4 }
 0xd22   :  { %1196 = vrot.lane.b32.xlu0 %v3386_v13, %s3511_s19 }
 0xd94   :  { %v1197_v45 = vpop.permute.xlu0 %1196 }
 0xd95   :  { %v1199_v33 = vmul.f32 %v1197_v45, %v1194_v44 }
 0xd97   :  { %v3920_v47 = vadd.f32 %v1201_v46, %v1199_v33 }
 0xd99   :  { %1204 = vrot.lane.b32.xlu0 %v3920_v47, %s3511_s19  ;;  %v1394_v45 = vrot.slane %v3920_v47, 6  ;;  %v3996_v47 = vld [vmem:[#allocation7 + $0x178] sm:$0xff] }
 0xdd9   :  { %v1095_v48 = vpop.f32.mrf.mxu1 }
 0xdda   :  { %v3925_v49 = vadd.f32 %v1095_v48, %v3860_v56 }
 0xddb   :  { %v3136_v50 = vpop.f32.mrf.mxu1 }
 0xe0b   :  { %v1205_v51 = vpop.permute.xlu0 %1204 }
 0xe0c   :  { %3176 = vmatmul.mubr.msk.f32.vlgmr.msra.gmra.mxu1 %vm235_vm3, %v1205_v51 }
 0xe0d   :  { %3194 = vmatprep.mubr.msk.f32.mxu1 %vm3509_vm2, %v3508_v4  ;;  %3179 = vmatpush3.msra.mxu1 %v3996_v47 }
 0xe0e   :  { %3180 = vmatprep.subr.mxu1 %v3508_v4 }
 0xecc   :  { %v1361_v53 = vpop.f32.mrf.mxu1 }
 0xecd   :  { %v1375_v56 = vadd.f32 %v1361_v53, %v3653_v19  ;;  %v1366_v63 = vrot.slane %v1361_v53, 6 }
 0xece   :  { %v3177_v57 = vpop.f32.mrf.mxu1 }
 0xecf   :  { %v1377_v35 = vrot.slane %v1375_v56, 6  ;;  %v1368_v0 = vadd.f32 %v1366_v63, %v3684_v31  ;;  %v3998_v63 = vld [vmem:[#allocation7 + $0x170] sm:$0xff] }
 0xed0   :  { %3181 = vmatpush3.msra.mxu1 %v3998_v63 }
 0xed1   :  { %1378 = vrot.lane.b32.xlu1 %v1377_v35, %s3510_s13  ;;  %v2726_v1 = vmul.f32 -1.442695, %v1368_v0  ;;  %3182 = vmatprep.subr.mxu1 %v3508_v4 }
 0xed3   :  { %3387 = vpow2.f32 %v2726_v1  ;;  %v4002_v1 = vld [vmem:[#allocation7 + $0x168] sm:$0xff] }
 0xed4   :  { %3183 = vmatpush3.msra.mxu1 %v4002_v1 }
 0xed5   :  { %3184 = vmatprep.subr.mxu1 %v3508_v4 }
 0xee0   :  { %v3388_v7 = vpop.eup %3387 }
 0xee1   :  { %v1372_v11 = vadd.f32 1.0, %v3388_v7 }
 0xee3   :  { %3389 = vrcp.f32 %v1372_v11  ;;  %v4007_v11 = vld [vmem:[#allocation7 + $0x160] sm:$0xff] }
 0xee4   :  { %3185 = vmatpush3.msra.mxu1 %v4007_v11 }
 0xee5   :  { %3186 = vmatprep.subr.mxu1 %v3508_v4 }
 0xef0   :  { %v3390_v38 = vpop.eup %3389 }
 0xef1   :  { %v1388_v46 = vsub.f32 1.0, %v3390_v38  ;;  %v1396_v48 = vmul.f32 %v3390_v38, %v1394_v45  ;;  %v4019_v45 = vld [vmem:[#allocation7 + $0x150] sm:$0xff] }
 0xf43   :  { %v1379_v39 = vpop.permute.xlu1 %1378 }
 0xf44   :  { %v1381_v40 = vmul.f32 %v3390_v38, %v1379_v39 }
 0xf46   :  { %1383 = vrot.lane.b32.xlu0 %v1381_v40, %s3510_s13 }
 0xf4a   :  { %1207 = vrot.lane.b32.xlu0 %v3665_v28, %s3512_s20  ;;  %s2751_s20 = sadd.s32 256, %s4222_s29 }
 0xf4b   :  { %s121_s22 = sadd.s32 %s2751_s20, %s108_s9 }
 0xf4c   :  { %s122_s23 = sld [smem:[#allocation5 + %s121_s22]] }
 0xfb8   :  { %v1384_v42 = vpop.permute.xlu0 %1383 }
 0xfb9   :  { %v1386_v43 = vadd.f32 %v1384_v42, %v3684_v31 }
 0xfbb   :  { %3391 = vtanh.f32 %v1386_v43 }
 0xfbc   :  { %v3969_v13 = vpop.permute.xlu0 %1207 }
 0xfbd   :  { %v1210_v44 = vsel %vm235_vm3, %v1205_v51, %v3969_v13 }
 0xfbe   :  { %3165 = vmatmul.mubr.msk.f32.vlgmr.msra.gmra.mxu0 %vm562_vm4, %v1210_v44 }
 0xfbf   :  { %3198 = vmatpush3.msra.mxu0 %v3590_v5  ;;  %3205 = vmatprep.mubr.msk.f32.mxu0 %vm3509_vm2, %v3508_v4 }
 0xfc0   :  { %3199 = vmatprep.subr.mxu0 %v3508_v4 }
 0xfc1   :  { %3200 = vmatpush3.msra.mxu0 %v3595_v6 }
 0xfc2   :  { %3201 = vmatprep.subr.mxu0 %v3508_v4 }
 0xfc3   :  { %3202 = vmatpush3.msra.mxu0 %v3605_v8 }
 0xfc4   :  { %3203 = vmatprep.subr.mxu0 %v3508_v4 }
 0xfc5   :  { %3204 = vmatpush3.msra.mxu0 %v3615_v10 }
 0xfc6   :  { %3208 = vmatprep.subr.mxu0 %v3508_v4 }
 0xfc8   :  { %v3392_v28 = vpop.eup %3391 }
 0xfc9   :  { %1390 = vrot.lane.b32.xlu1 %v3392_v28, %s3511_s19  ;;  %v4015_v28 = vld [vmem:[#allocation7 + $0x158] sm:$0xff] }
 0xfca   :  { %3187 = vmatpush3.msra.mxu1 %v4015_v28 }
 0xfcb   :  { %3188 = vmatprep.subr.mxu1 %v3508_v4 }
 0xfcc   :  { %3189 = vmatpush3.msra.mxu1 %v4019_v45 }
 0xfcd   :  { %3190 = vmatprep.subr.mxu1 %v3508_v4 }
0x103b   :  { %v1391_v33 = vpop.permute.xlu1 %1390 }
0x103c   :  { %v1393_v50 = vmul.f32 %v1391_v33, %v1388_v46  ;;  %v4023_v46 = vld [vmem:[#allocation7 + $0x148] sm:$0xff]  ;;  %v4027_v33 = vld [vmem:[#allocation7 + $0x140] sm:$0xff] }
0x103d   :  { %3191 = vmatpush3.msra.mxu1 %v4023_v46 }
0x103e   :  { %v3986_v6 = vadd.f32 %v1396_v48, %v1393_v50  ;;  %3192 = vmatprep.subr.mxu1 %v3508_v4 }
0x103f   :  { %3193 = vmatpush3.msra.mxu1 %v4027_v33 }
0x1040   :  { %v1486_v51 = vrot.slane %v3986_v6, 2  ;;  %3227 = vmatprep.subr.mxu1 %v3508_v4 }
0x1042   :  { %1487 = vrot.lane.b32.xlu1 %v1486_v51, %s3511_s19 }
0x107e   :  { %v1288_v53 = vpop.f32.mrf.mxu0 }
0x107f   :  { %v3991_v56 = vadd.f32 %v1288_v53, %v3925_v49 }
0x1080   :  { %v3166_v57 = vpop.f32.mrf.mxu0 }
0x10b4   :  { %v1488_v35 = vpop.permute.xlu1 %1487 }
0x10b5   :  { %3206 = vmatmul.mubr.msk.f32.vlgmr.msra.gmra.mxu0 %vm235_vm3, %v1488_v35 }
0x10b6   :  { %3224 = vmatprep.mubr.msk.f32.mxu0 %vm3509_vm2, %v3508_v4 }
0x1175   :  { %v1557_v0 = vpop.f32.mrf.mxu0 }
0x1176   :  { %v1571_v49 = vadd.f32 %v1557_v0, %v3653_v19  ;;  %v1562_v39 = vrot.slane %v1557_v0, 4 }
0x1177   :  { %v3207_v7 = vpop.f32.mrf.mxu0 }
0x1178   :  { %v1573_v38 = vrot.slane %v1571_v49, 4  ;;  %v1564_v40 = vadd.f32 %v1562_v39, %v3684_v31  ;;  %v3427_v7 = vld [vmem:[%s4356_s5 + $0x78] sm:$0xff]  ;;  %v1590_v39 = vrot.slane %v3986_v6, 6 }
0x117a   :  { %1574 = vrot.lane.b32.xlu0 %v1573_v38, %s3510_s13  ;;  %v2729_v42 = vmul.f32 -1.442695, %v1564_v40 }
0x117c   :  { %3393 = vpow2.f32 %v2729_v42 }
0x1189   :  { %v3394_v43 = vpop.eup %3393 }
0x118a   :  { %v1568_v44 = vadd.f32 1.0, %v3394_v43 }
0x118c   :  { %3395 = vrcp.f32 %v1568_v44 }
0x1199   :  { %v3396_v48 = vpop.eup %3395 }
0x119a   :  { %v1592_v42 = vmul.f32 %v3396_v48, %v1590_v39 }
0x11ec   :  { %v1575_v50 = vpop.permute.xlu0 %1574 }
0x11ed   :  { %v1577_v51 = vmul.f32 %v3396_v48, %v1575_v50 }
0x11ef   :  { %1579 = vrot.lane.b32.xlu1 %v1577_v51, %s3510_s13 }
0x11f3   :  { %1399 = vrot.lane.b32.xlu1 %v3986_v6, %s3511_s19  ;;  %v4062_v6 = vld [vmem:[#allocation7 + $0x1b8] sm:$0xff] }
0x11f4   :  { %3209 = vmatpush3.msra.mxu0 %v4062_v6 }
0x11f5   :  { %3210 = vmatprep.subr.mxu0 %v3508_v4 }
0x1261   :  { %v1580_v53 = vpop.permute.xlu1 %1579 }
0x1262   :  { %v1582_v57 = vadd.f32 %v1580_v53, %v3684_v31 }
0x1264   :  { %3397 = vtanh.f32 %v1582_v57 }
0x1265   :  { %v1400_v35 = vpop.permute.xlu1 %1399 }
0x1266   :  { %v1402_v0 = vsel %vm235_vm3, %v1400_v35, %v3969_v13  ;;  %v4068_v35 = vld [vmem:[#allocation7 + $0x1a8] sm:$0xff] }
0x1267   :  { %v1412_v49 = vrot.slane %v1402_v0, 2 }
0x1269   :  { %3195 = vmatmul.mubr.msk.f32.vlgmr.msra.gmra.mxu1 %vm562_vm4, %v1412_v49  ;;  %v4073_v49 = vld [vmem:[#allocation7 + $0x1a0] sm:$0xff] }
0x126a   :  { %3228 = vmatpush3.msra.mxu1 %v3590_v5  ;;  %3235 = vmatprep.mubr.msk.f32.mxu1 %vm3509_vm2, %v3508_v4  ;;  %v1584_v5 = vsub.f32 1.0, %v3396_v48  ;;  %v4064_v48 = vld [vmem:[#allocation7 + $0x1b0] sm:$0xff] }
0x126b   :  { %3229 = vmatprep.subr.mxu1 %v3508_v4  ;;  %3211 = vmatpush3.msra.mxu0 %v4064_v48 }
0x126c   :  { %3230 = vmatpush3.msra.mxu1 %v3427_v7  ;;  %3212 = vmatprep.subr.mxu0 %v3508_v4 }
0x126d   :  { %3231 = vmatprep.subr.mxu1 %v3508_v4  ;;  %3213 = vmatpush3.msra.mxu0 %v4068_v35 }
0x126e   :  { %3232 = vmatpush3.msra.mxu1 %v3605_v8  ;;  %3214 = vmatprep.subr.mxu0 %v3508_v4 }
0x126f   :  { %3233 = vmatprep.subr.mxu1 %v3508_v4  ;;  %3215 = vmatpush3.msra.mxu0 %v4073_v49 }
0x1270   :  { %3234 = vmatpush3.msra.mxu1 %v3615_v10  ;;  %3216 = vmatprep.subr.mxu0 %v3508_v4 }
0x1271   :  { %v3398_v38 = vpop.eup %3397  ;;  %3238 = vmatprep.subr.mxu1 %v3508_v4 }
0x1272   :  { %1586 = vrot.lane.b32.xlu0 %v3398_v38, %s3511_s19 }
0x12e4   :  { %v1587_v40 = vpop.permute.xlu0 %1586 }
0x12e5   :  { %v1589_v43 = vmul.f32 %v1587_v40, %v1584_v5 }
0x12e7   :  { %v4052_v44 = vadd.f32 %v1592_v42, %v1589_v43  ;;  %v4081_v42 = vld [vmem:[#allocation7 + $0x198] sm:$0xff]  ;;  %v4085_v43 = vld [vmem:[#allocation7 + $0x190] sm:$0xff] }
0x12e8   :  { %3217 = vmatpush3.msra.mxu0 %v4081_v42 }
0x12e9   :  { %v1682_v50 = vrot.slane %v4052_v44, 4  ;;  %3218 = vmatprep.subr.mxu0 %v3508_v4 }
0x12ea   :  { %3219 = vmatpush3.msra.mxu0 %v4085_v43 }
0x12eb   :  { %1683 = vrot.lane.b32.xlu0 %v1682_v50, %s3511_s19  ;;  %3220 = vmatprep.subr.mxu0 %v3508_v4  ;;  %v4089_v50 = vld [vmem:[#allocation7 + $0x188] sm:$0xff] }
0x12ec   :  { %3221 = vmatpush3.msra.mxu0 %v4089_v50 }
0x12ed   :  { %3222 = vmatprep.subr.mxu0 %v3508_v4 }
0x1329   :  { %v1481_v8 = vpop.f32.mrf.mxu1 }
0x132a   :  { %v4057_v10 = vadd.f32 %v1481_v8, %v3991_v56  ;;  %v4093_v8 = vld [vmem:[#allocation7 + $0x180] sm:$0xff] }
0x132b   :  { %v3196_v51 = vpop.f32.mrf.mxu1  ;;  %3223 = vmatpush3.msra.mxu0 %v4093_v8 }
0x132c   :  { %2879 = vmatprep.subr.mxu0 %v3865_v59  ;;  %v1786_v59 = vrot.slane %v4052_v44, 6 }
0x135d   :  { %v1684_v53 = vpop.permute.xlu0 %1683 }
0x135e   :  { %3236 = vmatmul.mubr.msk.f32.vlgmr.msra.gmra.mxu1 %vm235_vm3, %v1684_v53 }
0x135f   :  { %3254 = vmatprep.mubr.msk.f32.mxu1 %vm3509_vm2, %v3508_v4 }
0x141e   :  { %v1753_v57 = vpop.f32.mrf.mxu1 }
0x141f   :  { %v1767_v56 = vadd.f32 %v1753_v57, %v3653_v19  ;;  %v1758_v38 = vrot.slane %v1753_v57, 2 }
0x1420   :  { %v3237_v0 = vpop.f32.mrf.mxu1 }
0x1421   :  { %v1769_v7 = vrot.slane %v1767_v56, 2  ;;  %v1760_v19 = vadd.f32 %v1758_v38, %v3684_v31 }
0x1423   :  { %1770 = vrot.lane.b32.xlu1 %v1769_v7, %s3510_s13  ;;  %v2732_v5 = vmul.f32 -1.442695, %v1760_v19 }
0x1425   :  { %3399 = vpow2.f32 %v2732_v5  ;;  %v82_v5 = vlaneseq }
0x1432   :  { %v3400_v39 = vpop.eup %3399 }
0x1433   :  { %v1764_v40 = vadd.f32 1.0, %v3400_v39  ;;  %v3513_v39 = vmov 1983009808  }
0x1435   :  { %3401 = vrcp.f32 %v1764_v40  ;;  %v1943_v40 = vunpack.c.l.s4 %v3513_v39 }
0x1442   :  { %v3402_v51 = vpop.eup %3401 }
0x1495   :  { %v1771_v53 = vpop.permute.xlu1 %1770 }
0x1496   :  { %v1773_v57 = vmul.f32 %v3402_v51, %v1771_v53  ;;  %v1944_v53 = vunpack.c.0.s8 %v1943_v40 }
0x1498   :  { %1775 = vrot.lane.b32.xlu0 %v1773_v57, %s3510_s13  ;;  %v1887_v57 = vld [vmem:[#allocation7 + $0x18] sm:$0xff]  ;;  %s109_s13 = sadd.s32 %s2747_s30, %s108_s9 }
0x1499   :  { %s110_s1 = sld [smem:[#allocation5 + %s109_s13]] }
0x149c   :  { %1595 = vrot.lane.b32.xlu0 %v4052_v44, %s3511_s19  ;;  %v1888_v44 = vld [vmem:[#allocation7 + $0x20] sm:$0xff] }
0x150a   :  { %v1776_v56 = vpop.permute.xlu0 %1775 }
0x150b   :  { %v1778_v0 = vadd.f32 %v1776_v56, %v3684_v31  ;;  %v1878_v56 = vld [vmem:[%s4355_s4] sm:$0xff] }
0x150d   :  { %3403 = vtanh.f32 %v1778_v0  ;;  %v1885_v0 = vld [vmem:[#allocation7 + $0x8] sm:$0xff] }
0x150e   :  { %v1596_v7 = vpop.permute.xlu0 %1595 }
0x150f   :  { %v1598_v38 = vsel %vm235_vm3, %v1596_v7, %v3969_v13  ;;  %v1884_v7 = vld [vmem:[#allocation7] sm:$0xff] }
0x1510   :  { %v1608_v19 = vrot.slane %v1598_v38, 4 }
0x1512   :  { %3225 = vmatmul.mubr.msk.f32.vlgmr.msra.gmra.mxu0 %vm562_vm4, %v1608_v19 }
0x1513   :  { %2880 = vmatpush3.msra.mxu0 %v3722_v16  ;;  %v1802_v16 = vld [vmem:[#allocation7 + $0x1f8] sm:$0xff] }
0x1514   :  { %2881 = vmatprep.subr.mxu0 %v3867_v60  ;;  %3239 = vmatpush3.msra.mxu1 %v1802_v16 }
0x1515   :  { %2882 = vmatpush3.msra.mxu0 %v3724_v17  ;;  %v4121_v17 = vld [vmem:[#allocation7 + $0x1f0] sm:$0xff]  ;;  %3240 = vmatprep.subr.mxu1 %v3508_v4 }
0x1516   :  { %2883 = vmatprep.subr.mxu0 %v3871_v61  ;;  %3241 = vmatpush3.msra.mxu1 %v4121_v17  ;;  %v1788_v61 = vmul.f32 %v3402_v51, %v1786_v59 }
0x1517   :  { %2884 = vmatpush3.msra.mxu0 %v3728_v18  ;;  %v4124_v18 = vld [vmem:[#allocation7 + $0x1e8] sm:$0xff]  ;;  %3242 = vmatprep.subr.mxu1 %v3508_v4 }
0x1518   :  { %2885 = vmatprep.subr.mxu0 %v3875_v41  ;;  %3243 = vmatpush3.msra.mxu1 %v4124_v18 }
0x1519   :  { %2886 = vmatpush3.msra.mxu0 %v3732_v20  ;;  %v4128_v20 = vld [vmem:[#allocation7 + $0x1e0] sm:$0xff]  ;;  %3244 = vmatprep.subr.mxu1 %v3508_v4 }
0x151a   :  { %v3404_v31 = vpop.eup %3403  ;;  %2887 = vmatprep.subr.mxu0 %v3884_v12  ;;  %3245 = vmatpush3.msra.mxu1 %v4128_v20 }
0x151b   :  { %1782 = vrot.lane.b32.xlu1 %v3404_v31, %s3511_s19  ;;  %2888 = vmatpush3.msra.mxu0 %v3736_v21  ;;  %v4132_v21 = vld [vmem:[#allocation7 + $0x1d8] sm:$0xff]  ;;  %v1941_v31 = vcombine.high %v1878_v56, %v1878_v56 }
0x151c   :  { %2889 = vmatprep.subr.mxu0 %v3888_v15  ;;  %3246 = vmatprep.subr.mxu1 %v3508_v4  ;;  %v1891_v15 = vld [vmem:[#allocation7 + $0x38] sm:$0xff] }
0x151d   :  { %2890 = vmatpush3.msra.mxu0 %v3740_v22  ;;  %v4136_v22 = vld [vmem:[#allocation7 + $0x1d0] sm:$0xff]  ;;  %3247 = vmatpush3.msra.mxu1 %v4132_v21 }
0x151e   :  { %2891 = vmatprep.subr.mxu0 %v3892_v25  ;;  %3248 = vmatprep.subr.mxu1 %v3508_v4  ;;  %v1890_v25 = vld [vmem:[#allocation7 + $0x30] sm:$0xff] }
0x151f   :  { %2892 = vmatpush3.msra.mxu0 %v3744_v23  ;;  %v4140_v23 = vld [vmem:[#allocation7 + $0x1c8] sm:$0xff]  ;;  %3249 = vmatpush3.msra.mxu1 %v4136_v22 }
0x1520   :  { %2893 = vmatprep.subr.mxu0 %v3896_v26  ;;  %3250 = vmatprep.subr.mxu1 %v3508_v4  ;;  %v1889_v26 = vld [vmem:[#allocation7 + $0x28] sm:$0xff] }
0x1521   :  { %2894 = vmatpush3.msra.mxu0 %v3750_v24  ;;  %3251 = vmatpush3.msra.mxu1 %v4140_v23  ;;  %v4146_v24 = vld [vmem:[#allocation7 + $0x1c0] sm:$0xff] }
0x1522   :  { %2895 = vmatprep.subr.mxu0 %v3798_v2  ;;  %3252 = vmatprep.subr.mxu1 %v3508_v4  ;;  %v1780_v2 = vsub.f32 1.0, %v3402_v51  ;;  %v4154_v51 = vshrl.u32 %v82_v5, 7 }
0x1523   :  { %3253 = vmatpush3.msra.mxu1 %v4146_v24  ;;  %2896 = vmatpush3.msra.mxu0 %v1891_v15 }
0x1524   :  { %2914 = vmatprep.subr.mxu1 %v1802_v16  ;;  %2897 = vmatprep.subr.mxu0 %v3800_v3  ;;  %v4158_v3 = vsub.s32 %v1944_v53, %v4154_v51  ;;  %vm88_vm5 = vcmp.eq.s32.totalorder %v4154_v51, 1 }
0x1525   :  { %2898 = vmatpush3.msra.mxu0 %v1890_v25 }
0x1526   :  { %2899 = vmatprep.subr.mxu0 %v3804_v9  ;;  %v1886_v9 = vld [vmem:[#allocation7 + $0x10] sm:$0xff] }
0x1527   :  { %2900 = vmatpush3.msra.mxu0 %v1889_v26 }
0x1528   :  { %2901 = vmatprep.subr.mxu0 %v3809_v14  ;;  %v1948_v14 = vrot.slane %v1878_v56, %v4158_v3 }
0x1529   :  { %2902 = vmatpush3.msra.mxu0 %v1888_v44 }
0x152a   :  { %2903 = vmatprep.subr.mxu0 %v3817_v32  ;;  %v1956_v32 = vcombine.high %v1948_v14, %v1948_v14 }
0x152b   :  { %2904 = vmatpush3.msra.mxu0 %v1887_v57 }
0x152c   :  { %2905 = vmatprep.subr.mxu0 %v3821_v34  ;;  %2026 = vmatprep.mubr.f32.mxu0 %v1956_v32  ;;  %v2735_v34 = vld.sshfl [vmem:[%s4355_s4 + $0xc] sm:$0x3 pattern:$0x76325410] }
0x152d   :  { %2906 = vmatpush3.msra.mxu0 %v1886_v9  ;;  %2121 = vrot.lane.b32.xlu0 %v2735_v34, %s3504_s17  ;;  %s4214_s17 = sld [smem:[#allocation2]] }
0x152e   :  { %2907 = vmatprep.subr.mxu0 %v3825_v36 }
0x152f   :  { %2908 = vmatpush3.msra.mxu0 %v1885_v0 }
0x1530   :  { %2909 = vmatprep.subr.mxu0 %v3829_v37  ;;  %v1955_v37 = vrot.slane %v1941_v31, %v4158_v3 }
0x1531   :  { %2910 = vmatpush3.msra.mxu0 %v1884_v7 }
0x1532   :  { %2027 = vmatmul.mubr.f32.vlgmr.msra.gmra.mxu0 %v1948_v14  ;;  %v1957_v59 = vcombine.high %v1955_v37, %v1955_v37 }
0x1533   :  { %2218 = vmatprep.mubr.f32.mxu0 %v3508_v4  ;;  %s93_s6 = sshra.s32 %s4214_s17, 7  ;;  %s98_s2 = sand.u32 127, %s4214_s17 }
0x1534   :  { %s4220_s28 = sshll.u32 %s93_s6, 7  ;;  %s85_s10 = sld [smem:[#allocation5 + %s4214_s17]] }
0x1535   :  { %s2745_s7 = sadd.s32 128, %s4220_s28 }
0x1536   :  { %s99_s12 = sadd.s32 %s2745_s7, %s98_s2 }
0x1537   :  { %s100_s0 = sld [smem:[#allocation5 + %s99_s12]] }
0x158d   :  { %v1783_v60 = vpop.permute.xlu1 %1782 }
0x158e   :  { %v1785_v41 = vmul.f32 %v1783_v60, %v1780_v2 }
0x1590   :  { %v1789_v12 = vadd.f32 %v1788_v61, %v1785_v41  ;;  %v4251_v41 = vsub.s32 1, %v4154_v51 }
0x1592   :  { %1791 = vrot.lane.b32.xlu1 %v1789_v12, %s3511_s19 }
0x15d2   :  { %v1677_v38 = vpop.f32.mrf.mxu0 }
0x15d3   :  { %v4173_v36 = vadd.f32 %v1677_v38, %v4057_v10 }
0x15d4   :  { %v3226_v19 = vpop.f32.mrf.mxu0 }
0x1604   :  { %v1792_v16 = vpop.permute.xlu1 %1791 }
0x1605   :  { %v1794_v2 = vsel %vm235_vm3, %v1792_v16, %v3969_v13 }
0x1606   :  { %v1804_v60 = vrot.slane %v1794_v2, 6 }
0x1608   :  { %3255 = vmatmul.mubr.msk.f32.vlgmr.msra.gmra.mxu1 %vm562_vm4, %v1804_v60 }
0x1609   :  { %2915 = vmatpush3.msra.mxu1 %v3996_v47  ;;  %2096 = vmatprep.mubr.f32.mxu1 %v1957_v59 }
0x160a   :  { %2916 = vmatprep.subr.mxu1 %v4121_v17 }
0x160b   :  { %2917 = vmatpush3.msra.mxu1 %v3998_v63  ;;  %v101_v63 = vstv %s100_s0 }
0x160c   :  { %2918 = vmatprep.subr.mxu1 %v4124_v18 }
0x160d   :  { %2919 = vmatpush3.msra.mxu1 %v4002_v1  ;;  %v111_v1 = vstv %s110_s1 }
0x160e   :  { %2920 = vmatprep.subr.mxu1 %v4128_v20  ;;  %v4243_v10 = vsel %vm88_vm5, %v111_v1, %v101_v63  ;;  %v2122_v20 = vpop.permute.xlu0 %2121 }
0x160f   :  { %2921 = vmatpush3.msra.mxu1 %v4007_v11 }
0x1610   :  { %2922 = vmatprep.subr.mxu1 %v4132_v21 }
0x1611   :  { %2923 = vmatpush3.msra.mxu1 %v4015_v28 }
0x1612   :  { %2924 = vmatprep.subr.mxu1 %v4136_v22  ;;  %v4247_v22 = vsub.s32 0, %v4154_v51 }
0x1613   :  { %2925 = vmatpush3.msra.mxu1 %v4019_v45 }
0x1614   :  { %2926 = vmatprep.subr.mxu1 %v4140_v23 }
0x1615   :  { %2927 = vmatpush3.msra.mxu1 %v4023_v46 }
0x1616   :  { %2928 = vmatprep.subr.mxu1 %v4146_v24 }
0x1617   :  { %2929 = vmatpush3.msra.mxu1 %v4027_v33 }
0x1618   :  { %2930 = vmatprep.subr.mxu1 %v4062_v6 }
0x1619   :  { %2931 = vmatpush3.msra.mxu1 %v3930_v54  ;;  %v2136_v54 = vld [vmem:[#allocation8 + $0x8] sm:$0xff] }
0x161a   :  { %2932 = vmatprep.subr.mxu1 %v4064_v48  ;;  %2184 = vmatprep.subr.mxu0 %v2136_v54 }
0x161b   :  { %2933 = vmatpush3.msra.mxu1 %v3932_v52  ;;  %v2135_v52 = vld [vmem:[#allocation8] sm:$0xff] }
0x161c   :  { %2934 = vmatprep.subr.mxu1 %v4068_v35  ;;  %2185 = vmatpush1.msra.mxu0 %v2135_v52 }
0x161d   :  { %2935 = vmatpush3.msra.mxu1 %v3936_v55  ;;  %3257 = vmatprep.subr.mxu0 %v3508_v4 }
0x161e   :  { %2936 = vmatprep.subr.mxu1 %v4073_v49  ;;  %v2734_v49 = vld [vmem:[#allocation7 + $0x200] ss:$0 sm:$0xff] }
0x161f   :  { %2937 = vmatpush3.msra.mxu1 %v3941_v58 }
0x1620   :  { %2938 = vmatprep.subr.mxu1 %v4081_v42 }
0x1621   :  { %2939 = vmatpush3.msra.mxu1 %v3945_v62  ;;  %v2911_v62 = vpop.f32.mrf.mxu0 }
0x1622   :  { %2940 = vmatprep.subr.mxu1 %v4085_v43 }
0x1623   :  { %2941 = vmatpush3.msra.mxu1 %v3953_v27  ;;  %v86_v27 = vstv %s85_s10  ;;  %v2912_v13 = vpop.f32.mrf.mxu0 }
0x1624   :  { %2942 = vmatprep.subr.mxu1 %v4089_v50  ;;  %v2913_v46 = vadd.f32 %v2912_v13, %v2911_v62 }
0x1625   :  { %2943 = vmatpush3.msra.mxu1 %v3957_v29  ;;  %v91_v29 = vstv %s90_s11 }
0x1626   :  { %2944 = vmatprep.subr.mxu1 %v4093_v8 }
0x1627   :  { %2945 = vmatpush3.msra.mxu1 %v3961_v30  ;;  %v4237_v30 = vsel %vm88_vm5, %v91_v29, %v86_v27  ;;  %v2326_v29 = vld [vmem:[#allocation8 + $0xf0] sm:$0xff] }
0x1628   :  { %2097 = vmatmul.mubr.f32.vlgmr.msra.gmra.mxu1 %v1955_v37  ;;  %3292 = vmatprep.subr.mxu1 %v3508_v4  ;;  %v1882_v45 = vmul.f32 0.1, %v4237_v30 }
0x1629   :  { %3308 = vmatprep.mubr.msk.f32.mxu1 %vm3509_vm2, %v3508_v4 }
0x16c8   :  { %v1873_v55 = vpop.f32.mrf.mxu1 }
0x16c9   :  { %v1877_v28 = vadd.f32 %v1873_v55, %v4173_v36  ;;  %v2328_v55 = vld [vmem:[#allocation8 + $0x110] sm:$0xff] }
0x16ca   :  { %v3256_v58 = vpop.f32.mrf.mxu1 }
0x16cb   :  { %v1883_v48 = vmul.f32 %v1882_v45, %v1877_v28  ;;  %v2327_v58 = vld [vmem:[#allocation8 + $0x100] sm:$0xff] }
0x16cc   :  { %v2325_v45 = vld [vmem:[#allocation8 + $0xe0] sm:$0xff] }
0x16e8   :  { %v2946_v47 = vpop.f32.mrf.mxu1 }
0x16ea   :  { %v2947_v11 = vpop.f32.mrf.mxu1 }
0x16eb   :  { %v2948_v33 = vadd.f32 %v2947_v11, %v2946_v47 }
0x16ed   :  { %v2099_v6 = vadd.f32 %v2948_v33, %v2913_v46  ;;  %v2324_v46 = vld [vmem:[#allocation8 + $0xd0] sm:$0xff]  ;;  %v2323_v33 = vld [vmem:[#allocation8 + $0xc0] sm:$0xff] }
0x16ef   :  { %v2102_v35 = vmul.f32 %v2099_v6, %v4243_v10  ;;  %v2322_v6 = vld [vmem:[#allocation8 + $0xb0] sm:$0xff] }
0x16f1   :  { %v2103_v42 = vadd.f32 %v2102_v35, %v1883_v48  ;;  %v2321_v48 = vld [vmem:[#allocation8 + $0xa0] sm:$0xff]  ;;  %v2320_v35 = vld [vmem:[#allocation8 + $0x90] sm:$0xff] }
0x16f3   :  { %v2109_v43 = vadd.f32 %v2734_v49, %v2103_v42  ;;  %v2319_v49 = vld [vmem:[#allocation8 + $0x80] sm:$0xff]  ;;  %v2318_v42 = vld [vmem:[#allocation8 + $0x70] sm:$0xff] }
0x16f5   :  { %v2110_v50 = vmul.f32 0.5, %v2109_v43  ;;  %v2231_v8 = vsub.f32 0.0, %v2109_v43  ;;  %v2228_v15 = vrot.slane %v2109_v43, %v4247_v22  ;;  %v2253_v25 = vrot.slane %v2109_v43, %v4251_v41 }
0x16f7   :  { %v2111_v17 = vmul.f32 1.442695, %v2110_v50  ;;  %v2232_v18 = vmul.f32 1.442695, %v2231_v8  ;;  %v2316_v50 = vld [vmem:[#allocation8 + $0x50] sm:$0xff]  ;;  %v2315_v8 = vld [vmem:[#allocation8 + $0x40] sm:$0xff] }
0x16f9   :  { %3405 = vpow2.f32 %v2111_v17  ;;  %v2314_v17 = vld [vmem:[#allocation8 + $0x30] sm:$0xff] }
0x16fa   :  { %3407 = vpow2.f32 %v2232_v18  ;;  %v2313_v18 = vld [vmem:[#allocation8 + $0x20] sm:$0xff] }
0x1706   :  { %v3406_v21 = vpop.eup %3405 }
0x1707   :  { %v3408_v23 = vpop.eup %3407  ;;  %v2124_v24 = vmul.f32 %v3406_v21, %v2122_v20  ;;  %v2138_v20 = vld [vmem:[#allocation8 + $0x10] ss:$8 sm:$0x3] }
0x1708   :  { %v2237_v61 = vrot.slane %v3408_v23, %v4247_v22  ;;  %v2259_v12 = vrot.slane %v3408_v23, %v4251_v41  ;;  %v2143_v21 = vrot.slane %v2138_v20, %v4247_v22  ;;  %v2147_v23 = vrot.slane %v2138_v20, %v4251_v41 }
0x1709   :  { %2126 = vrot.lane.b32.xlu1 %v2124_v24, %s3514_s14 }
0x170a   :  { %2239 = vrot.lane.b32.xlu0 %v2237_v61, %s3514_s14 }
0x170d   :  { %2261 = vrot.lane.b32.xlu1 %v2259_v12, %s3514_s14 }
0x170e   :  { %2244 = vrot.lane.b32.xlu0 %v2228_v15, %s3514_s14 }
0x1711   :  { %2266 = vrot.lane.b32.xlu1 %v2253_v25, %s3514_s14 }
0x177b   :  { %v2127_v26 = vpop.permute.xlu1 %2126 }
0x177c   :  { %v4256_v5 = vadd.f32 %v2127_v26, %v2109_v43  ;;  %v2240_v39 = vpop.permute.xlu0 %2239  ;;  %v2317_v43 = vld [vmem:[#allocation8 + $0x60] sm:$0xff] }
0x177e   :  { %2736 = vmatmul.mubr.msk.f32.vlgmr.msra.gmra.mxu0 %vm2150_vm6, %v4256_v5  ;;  %v2229_v40 = vsub.f32 %v4256_v5, %v2228_v15  ;;  %v2254_v44 = vsub.f32 %v4256_v5, %v2253_v25 }
0x177f   :  { %v2262_v53 = vpop.permute.xlu1 %2261  ;;  %3289 = vmatprep.mubr.msk.f32.mxu0 %vm3509_vm2, %v3508_v4  ;;  %3258 = vmatpush3.msra.mxu0 %v2328_v55  ;;  %v2413_v55 = vld [vmem:[#allocation8 + $0x261] ss:$0 sm:$0xff] }
0x1780   :  { %v2230_v57 = vmul.f32 %v2229_v40, %v2229_v40  ;;  %v2255_v9 = vmul.f32 %v2254_v44, %v2254_v44  ;;  %v2245_v0 = vpop.permute.xlu0 %2244  ;;  %3259 = vmatprep.subr.mxu0 %v3508_v4  ;;  %v2336_v44 = vld [vmem:[#allocation8 + $0x210] sm:$0xff] }
0x1781   :  { %3260 = vmatpush3.msra.mxu0 %v2327_v58  ;;  %3293 = vmatpush3.msra.mxu1 %v2336_v44 }
0x1782   :  { %v2242_v56 = vmul.f32 %v2240_v39, %v2230_v57  ;;  %v2264_v14 = vmul.f32 %v2262_v53, %v2255_v9  ;;  %3261 = vmatprep.subr.mxu0 %v3508_v4  ;;  %v1880_v39 = vld [vmem:[%s4355_s4 + $0xa] sm:$0x3]  ;;  %3294 = vmatprep.subr.mxu1 %v3508_v4  ;;  %v2334_v57 = vld [vmem:[#allocation8 + $0x1f0] sm:$0xff] }
0x1783   :  { %v2267_v32 = vpop.permute.xlu1 %2266  ;;  %3262 = vmatpush3.msra.mxu0 %v2326_v29  ;;  %v2335_v53 = vld [vmem:[#allocation8 + $0x200] sm:$0xff] }
0x1784   :  { %v2247_v7 = vadd.f32 %v2245_v0, %v2242_v56  ;;  %v2269_v34 = vadd.f32 %v2267_v32, %v2264_v14  ;;  %3263 = vmatprep.subr.mxu0 %v3508_v4  ;;  %3295 = vmatpush3.msra.mxu1 %v2335_v53  ;;  %v2333_v9 = vld [vmem:[#allocation8 + $0x1e0] sm:$0xff]  ;;  %v2332_v56 = vld [vmem:[#allocation8 + $0x1d0] sm:$0xff] }
0x1785   :  { %3264 = vmatpush3.msra.mxu0 %v2325_v45  ;;  %3296 = vmatprep.subr.mxu1 %v3508_v4  ;;  %v2331_v14 = vld [vmem:[#allocation8 + $0x1c0] sm:$0xff]  ;;  %v2330_v0 = vld [vmem:[#allocation8 + $0x1b0] sm:$0xff] }
0x1786   :  { %v2248_v38 = vadd.f32 1.837877, %v2247_v7  ;;  %v2270_v36 = vadd.f32 1.837877, %v2269_v34  ;;  %3265 = vmatprep.subr.mxu0 %v3508_v4  ;;  %3297 = vmatpush3.msra.mxu1 %v2334_v57  ;;  %v2329_v32 = vld [vmem:[#allocation8 + $0x1a0] sm:$0xff] }
0x1787   :  { %3266 = vmatpush3.msra.mxu0 %v2324_v46  ;;  %3298 = vmatprep.subr.mxu1 %v3508_v4  ;;  %v2337_v7 = vld [vmem:[#allocation8 + $0x260] ss:$0 sm:$0xff]  ;;  %v2578_v46 = vld [vmem:[#allocation8 + $0x170] sm:$0xff] }
0x1788   :  { %v2249_v19 = vmul.f32 -0.5, %v2248_v38  ;;  %v2271_v31 = vmul.f32 -0.5, %v2270_v36  ;;  %3267 = vmatprep.subr.mxu0 %v3508_v4  ;;  %3299 = vmatpush3.msra.mxu1 %v2333_v9  ;;  %v2579_v45 = vld [vmem:[#allocation8 + $0x180] sm:$0xff] }
0x1789   :  { %3268 = vmatpush3.msra.mxu0 %v2323_v33  ;;  %3300 = vmatprep.subr.mxu1 %v3508_v4  ;;  %v2577_v33 = vld [vmem:[#allocation8 + $0x160] sm:$0xff] }
0x178a   :  { %v2292_v37 = vmax.f32 %v2249_v19, %v2271_v31  ;;  %v2273_v16 = vsel %vm2272_vm7, %v2249_v19, 0.0  ;;  %v2276_v2 = vsel %vm2272_vm7, %v2271_v31, 0.0  ;;  %3269 = vmatprep.subr.mxu0 %v3508_v4  ;;  %3301 = vmatpush3.msra.mxu1 %v2332_v56 }
0x178b   :  { %2274 = vadd.xlane.f32.xlu0 %v2273_v16  ;;  %2277 = vadd.xlane.f32.xlu1 %v2276_v2 }
0x178c   :  { %v2293_v59 = vsub.f32 %v2249_v19, %v2292_v37  ;;  %v2297_v60 = vsub.f32 %v2271_v31, %v2292_v37  ;;  %3270 = vmatpush3.msra.mxu0 %v2322_v6  ;;  %3302 = vmatprep.subr.mxu1 %v3508_v4  ;;  %v2576_v6 = vld [vmem:[#allocation8 + $0x150] sm:$0xff] }
0x178d   :  { %3271 = vmatprep.subr.mxu0 %v3508_v4  ;;  %3303 = vmatpush3.msra.mxu1 %v2331_v14 }
0x178e   :  { %v2294_v54 = vmul.f32 1.442695, %v2293_v59  ;;  %v2298_v52 = vmul.f32 1.442695, %v2297_v60  ;;  %3272 = vmatpush3.msra.mxu0 %v2321_v48  ;;  %3304 = vmatprep.subr.mxu1 %v3508_v4  ;;  %v2497_v59 = vld [vmem:[#allocation8 + $0x250] sm:$0xff]  ;;  %v2496_v60 = vld [vmem:[#allocation8 + $0x240] sm:$0xff] }
0x178f   :  { %3273 = vmatprep.subr.mxu0 %v3508_v4  ;;  %3305 = vmatpush3.msra.mxu1 %v2330_v0  ;;  %v2575_v48 = vld [vmem:[#allocation8 + $0x140] sm:$0xff] }
0x1790   :  { %3409 = vpow2.f32 %v2294_v54  ;;  %3274 = vmatpush3.msra.mxu0 %v2320_v35  ;;  %3306 = vmatprep.subr.mxu1 %v3508_v4  ;;  %v2495_v54 = vld [vmem:[#allocation8 + $0x230] sm:$0xff] }
0x1791   :  { %3411 = vpow2.f32 %v2298_v52  ;;  %3275 = vmatprep.subr.mxu0 %v3508_v4  ;;  %3307 = vmatpush3.msra.mxu1 %v2329_v32  ;;  %v2494_v52 = vld [vmem:[#allocation8 + $0x220] sm:$0xff]  ;;  %v2574_v35 = vld [vmem:[#allocation8 + $0x130] sm:$0xff] }
0x1792   :  { %3276 = vmatpush3.msra.mxu0 %v2319_v49  ;;  %3311 = vmatprep.subr.mxu1 %v3508_v4  ;;  %v2573_v49 = vld [vmem:[#allocation8 + $0x120] sm:$0xff] }
0x1793   :  { %3277 = vmatprep.subr.mxu0 %v3508_v4 }
0x1794   :  { %3278 = vmatpush3.msra.mxu0 %v2318_v42 }
0x1795   :  { %3279 = vmatprep.subr.mxu0 %v3508_v4 }
0x1796   :  { %3280 = vmatpush3.msra.mxu0 %v2317_v43 }
0x1797   :  { %3281 = vmatprep.subr.mxu0 %v3508_v4 }
0x1798   :  { %3282 = vmatpush3.msra.mxu0 %v2316_v50 }
0x1799   :  { %3283 = vmatprep.subr.mxu0 %v3508_v4 }
0x179a   :  { %3284 = vmatpush3.msra.mxu0 %v2315_v8  ;;  %v2130_v8 = vld [vmem:[%s4354_s3] sm:$0x3]  ;;  %s2749_s3 = sadd.s32 256, %s4220_s28 }
0x179b   :  { %3285 = vmatprep.subr.mxu0 %v3508_v4  ;;  %s115_s21 = sadd.s32 %s2749_s3, %s98_s2  ;;  %v2131_v32 = vmul.f32 0.1, %v2130_v8 }
0x179c   :  { %3286 = vmatpush3.msra.mxu0 %v2314_v17  ;;  %s116_s5 = sld [smem:[#allocation5 + %s115_s21]] }
0x179d   :  { %v3410_v62 = vpop.eup %3409  ;;  %3287 = vmatprep.subr.mxu0 %v3508_v4 }
0x179e   :  { %v3412_v27 = vpop.eup %3411  ;;  %3288 = vmatpush3.msra.mxu0 %v2313_v18 }
0x179f   :  { %v2300_v13 = vadd.f32 %v3412_v27, %v3410_v62 }
0x17a1   :  { %3413 = vlog2.f32 %v2300_v13 }
0x17ae   :  { %v3414_v47 = vpop.eup %3413 }
0x17af   :  { %v2302_v63 = vmul.f32 0.6931472, %v3414_v47 }
0x17b1   :  { %v2303_v1 = vadd.f32 %v2302_v63, %v2292_v37 }
0x17b3   :  { %v2738_v11 = vadd.f32 -0.6931472, %v2303_v1 }
0x17b5   :  { %v2305_v28 = vsel %vm2272_vm7, %v2738_v11, 0.0 }
0x17b6   :  { %2306 = vadd.xlane.f32.xlu0 %v2305_v28  ;;  %v2580_v28 = vld [vmem:[#allocation8 + $0x190] sm:$0xff] }
0x183e   :  { %v2220_v24 = vpop.f32.mrf.mxu0 }
0x183f   :  { %v4284_v12 = vadd.f32 %v2220_v24, %v2143_v21 }
0x1840   :  { %v2222_v61 = vpop.f32.mrf.mxu0 }
0x1841   :  { %v4286_v15 = vadd.f32 %v2222_v61, %v2147_v23  ;;  %v2275_v61 = vpop.xlane.xlu0 %2274 }
0x1843   :  { %v2309_v25 = vmul.f32 1.442695, %v4286_v15  ;;  %v2672_v26 = vcombine.low %v4284_v12, %v4286_v15 }
0x1845   :  { %3415 = vpow2.f32 %v2309_v25  ;;  %v2278_v25 = vpop.xlane.xlu1 %2277 }
0x1852   :  { %v3416_v40 = vpop.eup %3415 }
0x1853   :  { %v2311_v22 = vmul.f32 %v3416_v40, %v1880_v39  ;;  %v2279_v39 = vmax.f32 %v2275_v61, %v2278_v25 }
0x1855   :  { %v4295_v41 = vadd.f32 %v2311_v22, %v4284_v12  ;;  %v2280_v40 = vsub.f32 %v2275_v61, %v2279_v39  ;;  %v2284_v22 = vsub.f32 %v2278_v25, %v2279_v39 }
0x1857   :  { %3290 = vmatmul.mubr.f32.vlgmr.msra.gmra.mxu0 %v4295_v41  ;;  %v2654_v18 = vsub.f32 %v2130_v8, %v4295_v41  ;;  %v2281_v44 = vmul.f32 1.442695, %v2280_v40  ;;  %v2285_v53 = vmul.f32 1.442695, %v2284_v22 }
0x1917   :  { %v2404_v34 = vpop.f32.mrf.mxu0 }
0x1918   :  { %v2405_v38 = vadd.f32 %v2404_v34, %v2337_v7  ;;  %v1879_v7 = vld [vmem:[%s4355_s4 + $0x8] sm:$0x3] }
0x1919   :  { %v3291_v36 = vpop.f32.mrf.mxu0 }
0x191a   :  { %v2409_v19 = vmul.f32 1.442695, %v2405_v38  ;;  %vm2408_vm8 = vcmp.gt.f32.partialorder %v2405_v38, 0.0  ;;  %v117_v36 = vstv %s116_s5 }
0x191c   :  { %3417 = vpow2.f32 %v2409_v19  ;;  %v123_v19 = vstv %s122_s23 }
0x1929   :  { %v3418_v31 = vpop.eup %3417 }
0x192a   :  { %v2739_v37 = vadd.f32 -1.0, %v3418_v31  ;;  %v2571_v16 = vsel %vm2408_vm8, 1.0, %v3418_v31  ;;  %v2133_v31 = vmul.f32 %v1879_v7, %v4243_v10 }
0x192c   :  { %v2412_v2 = vsel %vm2408_vm8, %v2405_v38, %v2739_v37  ;;  %v2307_v38 = vpop.xlane.xlu0 %2306  ;;  %v2132_v37 = vmul.f32 %v2131_v32, %v4237_v30  ;;  %v2680_v30 = vrot.slane %v2672_v26, %v4158_v3 }
0x192d   :  { %3309 = vmatmul.mubr.msk.f32.vlgmr.msra.gmra.mxu1 %vm562_vm4, %v2412_v2  ;;  %v124_v2 = vsel %vm88_vm5, %v123_v19, %v117_v36 }
0x192e   :  { %3319 = vmatprep.mubr.msk.f32.mxu1 %vm3509_vm2, %v3508_v4  ;;  %3312 = vmatpush3.msra.mxu1 %v2497_v59 }
0x192f   :  { %3313 = vmatprep.subr.mxu1 %v3508_v4 }
0x1930   :  { %3314 = vmatpush3.msra.mxu1 %v2496_v60  ;;  %v2134_v60 = vadd.f32 %v2133_v31, %v2132_v37 }
0x1931   :  { %3315 = vmatprep.subr.mxu1 %v3508_v4 }
0x1932   :  { %3316 = vmatpush3.msra.mxu1 %v2495_v54 }
0x1933   :  { %3317 = vmatprep.subr.mxu1 %v3508_v4 }
0x1934   :  { %3318 = vmatpush3.msra.mxu1 %v2494_v52 }
0x1935   :  { %3322 = vmatprep.subr.mxu1 %v3508_v4 }
0x19ed   :  { %v2483_v58 = vpop.f32.mrf.mxu1 }
0x19ee   :  { %v2484_v62 = vadd.f32 %v2483_v58, %v2413_v55 }
0x19ef   :  { %v3310_v27 = vpop.f32.mrf.mxu1 }
0x19f0   :  { %v2488_v29 = vmul.f32 1.442695, %v2484_v62  ;;  %vm2487_vm9 = vcmp.gt.f32.partialorder %v2484_v62, 0.0 }
0x19f2   :  { %3419 = vpow2.f32 %v2488_v29 }
0x19f3   :  { %3421 = vpow2.f32 %v2281_v44 }
0x19f4   :  { %3423 = vpow2.f32 %v2285_v53 }
0x19ff   :  { %v3420_v13 = vpop.eup %3419 }
0x1a00   :  { %v2741_v47 = vadd.f32 -1.0, %v3420_v13  ;;  %v2492_v1 = vsel %vm2487_vm9, 1.0, %v3420_v13  ;;  %v3422_v41 = vpop.eup %3421 }
0x1a01   :  { %v3424_v57 = vpop.eup %3423 }
0x1a02   :  { %v2491_v63 = vsel %vm2487_vm9, %v2484_v62, %v2741_v47  ;;  %v2287_v9 = vadd.f32 %v3424_v57, %v3422_v41 }
0x1a03   :  { %v2493_v11 = vmul.f32 %v2492_v1, %v2491_v63 }
0x1a04   :  { %3425 = vlog2.f32 %v2287_v9 }
0x1a05   :  { %3320 = vmatmul.mubr.msk.f32.vlgmr.msra.gmra.mxu1 %vm235_vm3, %v2493_v11 }
0x1a06   :  { %3323 = vmatpush3.msra.mxu1 %v2580_v28  ;;  %3338 = vmatprep.mubr.msk.f32.mxu1 %vm3509_vm2, %v3508_v4 }
0x1a07   :  { %3324 = vmatprep.subr.mxu1 %v3508_v4 }
0x1a08   :  { %3325 = vmatpush3.msra.mxu1 %v2579_v45 }
0x1a09   :  { %3326 = vmatprep.subr.mxu1 %v3508_v4 }
0x1a0a   :  { %3327 = vmatpush3.msra.mxu1 %v2578_v46 }
0x1a0b   :  { %3328 = vmatprep.subr.mxu1 %v3508_v4 }
0x1a0c   :  { %3329 = vmatpush3.msra.mxu1 %v2577_v33 }
0x1a0d   :  { %3330 = vmatprep.subr.mxu1 %v3508_v4 }
0x1a0e   :  { %3331 = vmatpush3.msra.mxu1 %v2576_v6 }
0x1a0f   :  { %3332 = vmatprep.subr.mxu1 %v3508_v4 }
0x1a10   :  { %3333 = vmatpush3.msra.mxu1 %v2575_v48 }
0x1a11   :  { %3334 = vmatprep.subr.mxu1 %v3508_v4  ;;  %v3426_v56 = vpop.eup %3425 }
0x1a12   :  { %3335 = vmatpush3.msra.mxu1 %v2574_v35  ;;  %v2289_v14 = vmul.f32 0.6931472, %v3426_v56 }
0x1a13   :  { %3336 = vmatprep.subr.mxu1 %v3508_v4 }
0x1a14   :  { %3337 = vmatpush3.msra.mxu1 %v2573_v49  ;;  %v2290_v0 = vadd.f32 %v2289_v14, %v2279_v39 }
0x1a16   :  { %v2737_v34 = vadd.f32 -0.6931472, %v2290_v0 }
0x1ac5   :  { %v2567_v42 = vpop.f32.mrf.mxu1 }
0x1ac6   :  { %v2572_v43 = vmul.f32 %v2571_v16, %v2567_v42  ;;  %v2308_v16 = vsub.f32 %v2737_v34, %v2307_v38 }
0x1ac7   :  { %v3321_v50 = vpop.f32.mrf.mxu1 }
0x1ac8   :  { %3339 = vmatmul.mubr.msk.f32.vlgmr.msra.gmra.mxu1 %vm562_vm4, %v2572_v43  ;;  %v2663_v52 = vsel %vm2150_vm6, %v4256_v5, %v2308_v16 }
0x1b88   :  { %v2650_v17 = vpop.f32.mrf.mxu1 }
0x1b89   :  { %v2655_v20 = vmul.f32 0.001, %v2650_v17 }
0x1b8a   :  { %v3340_v21 = vpop.f32.mrf.mxu1 }
0x1b8b   :  { %v2656_v23 = vadd.f32 %v2655_v20, %v2654_v18 }
0x1b8d   :  { %v2657_v24 = vmul.f32 %v2656_v23, %v2656_v23 }
0x1b8f   :  { %v2659_v4 = vsel %vm2658_vm10, %v2657_v24, 0.0 }
0x1b90   :  { %2660 = vadd.xlane.f32.xlu0 %v2659_v4 }
0x1c19   :  { %v2661_v59 = vpop.xlane.xlu0 %2660 }
0x1c1a   :  { %v2662_v54 = vmul.f32 %v2661_v59, %v124_v2 }
0x1c1c   :  { %v2665_v55 = vsel %vm2664_vm11, %v2663_v52, %v2662_v54 }
0x1c1d   :  { %v2667_v58 = vsel %vm2666_vm12, %v2665_v55, 0.0 }
0x1c1e   :  { %v2673_v62 = vcombine.low %v2134_v60, %v2667_v58 }
0x1c20   :  { %v2687_v10 = vrot.slane %v2673_v62, %v4158_v3 }
0x1c22   :  { %v2688_v51 = vcombine.low %v2680_v30, %v2687_v10 }
0x1c24   :  { %2690 = vst [vmem:[%s4359_s8] sm:$0xff] %v2688_v51 }
0x1c25   :  { %2695 = vsyncpa [#allocation3], 1 }
0x1c26   :  { %2696 = vsyncpa [#allocation9], 1 }
0x1c27   :  { %2697 = vsyncpa [#allocation4], 1 }
0x1c28   :  { %2698 = vsyncpa [#allocation6], 1 }

</bundles_post_ra>
